<compile_context>
chip_gen: v7x
topology: tpu7x:2x2x1
jax: 0.10.0
libtpu: 0.0.40
codegen_flags: <defaults>
</compile_context>

<pallas_src>
import functools

import jax
import jax.numpy as jnp
from jax import lax
from jax.experimental import pallas as pl
from jax.experimental.pallas import tpu as pltpu

EMBED_DIMS = 1024
HIDDEN = 64
CLAMP_LIMIT = 6.0
_LANE = 128


def _head_kernel(x_ref, w1_ref, b1_ref, w2_ref, b2_ref, o_ref, *, clamp_limit):
    # x_ref: (bm, D) tile of backbone features (batch on sublanes, D on lanes).
    x = jnp.maximum(x_ref[...], 0.0)                                    # ReLU
    h = jnp.dot(x, w1_ref[...], preferred_element_type=jnp.float32)    # (bm, Hp)
    h = jnp.maximum(h + b1_ref[...], 0.0)                               # +b1, ReLU
    # nn.Dropout() in eval mode is the identity (exact inference semantics).
    # Final Linear(H, 1) as a (1, Hp) x (bm, Hp)^T contraction -> (1, bm) row:
    # batch lands on the lane axis, so the store is lane-dense (no vst.msk).
    out = lax.dot_general(
        w2_ref[...], h,
        dimension_numbers=(((1,), (1,)), ((), ())),
        preferred_element_type=jnp.float32)                             # (1, bm)
    out = out + b2_ref[0, 0]
    o_ref[...] = jnp.clip(out, 0.0, clamp_limit)                        # clamp [0, lim]


def _round_up(x, m):
    return ((x + m - 1) // m) * m


def _pick_bm(b_pad):
    # Largest lane-aligned tile (<= 1024 rows) that divides the padded batch.
    # 1024 x 1024 x 4 B double-buffered (~8 MiB) + resident weights stays well
    # under the default scoped-VMEM limit on every generation (v5e/v6e/v7x).
    for cand in (1024, 512, 256, 128):
        if b_pad % cand == 0:
            return cand
    return b_pad


def video_encoder_head(feats, w1, b1, w2, b2, *, clamp_limit=CLAMP_LIMIT,
                       bm=None, feature_dtype=jnp.float32):
    """final_layer head + clamp.

    feats: (B, D) backbone features (stand-in for vid_trans(x) output).
    w1/b1/w2/b2: PyTorch Linear layout, i.e. w1 (64, D), w2 (1, 64).
    feature_dtype: jnp.bfloat16 halves the dominant HBM stream (v6e/v7x);
                   keep float32 on v5e / for exact-f32 math.
    """
    feats = jnp.asarray(feats)
    B, D = feats.shape
    H = w1.shape[0]

    # Zero-pad the hidden dim to a full 128-lane width (padded units output 0).
    Hp = _round_up(max(H, _LANE), _LANE)
    w1_t = jnp.zeros((D, Hp), jnp.float32).at[:, :H].set(
        jnp.asarray(w1, jnp.float32).T)
    b1_r = jnp.zeros((1, Hp), jnp.float32).at[:, :H].set(
        jnp.asarray(b1, jnp.float32))
    w2_r = jnp.zeros((1, Hp), jnp.float32).at[:, :H].set(
        jnp.asarray(w2, jnp.float32).reshape(1, H))
    b2_s = jnp.asarray(b2, jnp.float32).reshape(1, 1)

    # Pad the batch so a lane-aligned tile divides it (no divisibility assert).
    B_pad = _round_up(max(B, _LANE), _LANE)
    if bm is None:
        bm = _pick_bm(B_pad)
    else:
        B_pad = _round_up(B_pad, bm)

    feats_p = feats.astype(feature_dtype)
    if B_pad > B:
        feats_p = jnp.zeros((B_pad, D), feats_p.dtype).at[:B, :].set(feats_p)
    w1_in = w1_t.astype(feature_dtype)

    kernel = functools.partial(_head_kernel, clamp_limit=float(clamp_limit))

    # Advisory cost hint: this op is HBM-bandwidth bound, not FLOP bound.
    feat_bytes = B_pad * D * jnp.dtype(feature_dtype).itemsize
    w_bytes = (D * Hp) * jnp.dtype(feature_dtype).itemsize + 2 * Hp * 4 + 4
    cost = pl.CostEstimate(
        flops=2 * B_pad * D * Hp + 2 * B_pad * Hp,
        transcendentals=0,
        bytes_accessed=feat_bytes + w_bytes + B_pad * 4,
    )

    out_row = pl.pallas_call(
        kernel,
        out_shape=jax.ShapeDtypeStruct((1, B_pad), jnp.float32),
        grid_spec=pl.GridSpec(
            grid=(B_pad // bm,),
            in_specs=[
                pl.BlockSpec((bm, D), lambda i: (i, 0)),   # feature tile (streamed)
                pl.BlockSpec((D, Hp), lambda i: (0, 0)),   # W1^T (resident)
                pl.BlockSpec((1, Hp), lambda i: (0, 0)),   # b1 (resident)
                pl.BlockSpec((1, Hp), lambda i: (0, 0)),   # W2 row (resident)
                pl.BlockSpec((1, 1), lambda i: (0, 0),
                             memory_space=pltpu.MemorySpace.SMEM),  # b2 scalar
            ],
            out_specs=pl.BlockSpec((1, bm), lambda i: (0, i)),      # lane-dense row
        ),
        compiler_params=pltpu.CompilerParams(
            dimension_semantics=("parallel",)),
        cost_estimate=cost,
    )(feats_p, w1_in, b1_r, w2_r, b2_s)

    return out_row[0, :B].reshape(B, 1)


def reference_head(feats, w1, b1, w2, b2, clamp_limit=CLAMP_LIMIT):
    x = jnp.maximum(feats, 0.0)
    x = x @ w1.T + b1
    x = jnp.maximum(x, 0.0)
    x = x @ w2.T + b2
    return jnp.clip(x, 0.0, clamp_limit)


if __name__ == "__main__":
    key = jax.random.PRNGKey(0)
    k_feat, k_w1, k_b1, k_w2, k_b2, k_feat2 = jax.random.split(key, 6)

    # Deterministic parameters (PyTorch Linear layout: (out_features, in_features)).
    w1 = jax.random.normal(k_w1, (HIDDEN, EMBED_DIMS), dtype=jnp.float32) * 0.02
    b1 = jax.random.normal(k_b1, (HIDDEN,), dtype=jnp.float32) * 0.02
    w2 = jax.random.normal(k_w2, (1, HIDDEN), dtype=jnp.float32) * 0.02
    b2 = jax.random.normal(k_b2, (1,), dtype=jnp.float32) * 0.02

    # Small batch (single padded 128-row tile).
    feats = jax.random.normal(k_feat, (16, EMBED_DIMS), dtype=jnp.float32)
    out = jax.block_until_ready(video_encoder_head(feats, w1, b1, w2, b2))
    ref = reference_head(feats, w1, b1, w2, b2)
    assert out.shape == (16, 1), out.shape
    assert jnp.allclose(out, ref, atol=1e-5, rtol=1e-5), "mismatch vs reference (B=16)"

    # Non-multiple batch -> multi-tile grid with a zero-padded tail.
    feats2 = jax.random.normal(k_feat2, (300, EMBED_DIMS), dtype=jnp.float32)
    out2 = jax.block_until_ready(video_encoder_head(feats2, w1, b1, w2, b2))
    ref2 = reference_head(feats2, w1, b1, w2, b2)
    assert out2.shape == (300, 1), out2.shape
    assert jnp.allclose(out2, ref2, atol=1e-5, rtol=1e-5), "mismatch vs reference (B=300)"

    # Optional bf16 feature stream (halves HBM traffic on v6e/v7x); loose check.
    out_bf16 = jax.block_until_ready(
        video_encoder_head(feats2, w1, b1, w2, b2, feature_dtype=jnp.bfloat16))
    assert jnp.allclose(out_bf16, ref2, atol=0.1), "bf16 path mismatch"

    print("KERNEL_OK")
</pallas_src>

<mosaic_0001>
module attributes {stable_mosaic.version = 11 : i64} {
  func.func @_head_kernel(%arg0: i32, %arg1: memref<128x1024xf32, #tpu.memory_space<vmem>>, %arg2: memref<1024x128xf32, #tpu.memory_space<vmem>>, %arg3: memref<1x128xf32, #tpu.memory_space<vmem>>, %arg4: memref<1x128xf32, #tpu.memory_space<vmem>>, %arg5: memref<1x1xf32, #tpu.memory_space<smem>>, %arg6: memref<1x128xf32, #tpu.memory_space<vmem>>) attributes {dimension_semantics = [#tpu.dimension_semantics<parallel>], iteration_bounds = array<i64: 1>, scalar_prefetch = 0 : i64, scratch_operands = 0 : i64, tpu.core_type = #tpu.core_type<tc>, window_params = [{transform_indices = @transform_0, window_bounds = array<i64: 128, 1024>}, {pipeline_mode = #tpu.pipeline_mode<synchronous>, transform_indices = @transform_1, window_bounds = array<i64: 1024, 128>}, {pipeline_mode = #tpu.pipeline_mode<synchronous>, transform_indices = @transform_2, window_bounds = array<i64: 1, 128>}, {pipeline_mode = #tpu.pipeline_mode<synchronous>, transform_indices = @transform_3, window_bounds = array<i64: 1, 128>}, {transform_indices = @transform_4, window_bounds = array<i64: 1, 1>}, {transform_indices = @transform_5, window_bounds = array<i64: 1, 128>}]} {
    %c0 = arith.constant 0 : index
    %c0_0 = arith.constant 0 : index
    %0 = vector.load %arg1[%c0, %c0_0] : memref<128x1024xf32, #tpu.memory_space<vmem>>, vector<128x1024xf32>
    %cst = arith.constant 0.000000e+00 : f32
    %1 = vector.broadcast %cst : f32 to vector<128x1024xf32>
    %2 = arith.maximumf %0, %1 : vector<128x1024xf32>
    %c0_1 = arith.constant 0 : index
    %c0_2 = arith.constant 0 : index
    %3 = vector.load %arg2[%c0_1, %c0_2] : memref<1024x128xf32, #tpu.memory_space<vmem>>, vector<1024x128xf32>
    %cst_3 = arith.constant dense<0.000000e+00> : vector<128x128xf32>
    %4 = tpu.matmul %2, %3, %cst_3 {dimension_numbers = #tpu.dot_dimension_numbers<[1], [0], [0], [1], [0, 0, 1, 1], [], []>} : vector<128x1024xf32>, vector<1024x128xf32>, vector<128x128xf32> -> vector<128x128xf32>
    %c0_4 = arith.constant 0 : index
    %c0_5 = arith.constant 0 : index
    %5 = vector.load %arg3[%c0_4, %c0_5] : memref<1x128xf32, #tpu.memory_space<vmem>>, vector<1x128xf32>
    %6 = vector.broadcast %5 : vector<1x128xf32> to vector<128x128xf32>
    %7 = arith.addf %4, %6 : vector<128x128xf32>
    %cst_6 = arith.constant 0.000000e+00 : f32
    %8 = vector.broadcast %cst_6 : f32 to vector<128x128xf32>
    %9 = arith.maximumf %7, %8 : vector<128x128xf32>
    %c0_7 = arith.constant 0 : index
    %c0_8 = arith.constant 0 : index
    %10 = vector.load %arg4[%c0_7, %c0_8] : memref<1x128xf32, #tpu.memory_space<vmem>>, vector<1x128xf32>
    %cst_9 = arith.constant dense<0.000000e+00> : vector<1x128xf32>
    %11 = tpu.matmul %10, %9, %cst_9 {dimension_numbers = #tpu.dot_dimension_numbers<[1], [1], [0], [0], [0, 0, 1, 0], [], []>} : vector<1x128xf32>, vector<128x128xf32>, vector<1x128xf32> -> vector<1x128xf32>
    %c0_10 = arith.constant 0 : index
    %c0_11 = arith.constant 0 : index
    %12 = memref.load %arg5[%c0_10, %c0_11] : memref<1x1xf32, #tpu.memory_space<smem>>
    %13 = vector.broadcast %12 : f32 to vector<1x128xf32>
    %14 = arith.addf %11, %13 : vector<1x128xf32>
    %cst_12 = arith.constant 0.000000e+00 : f32
    %cst_13 = arith.constant 6.000000e+00 : f32
    %15 = vector.broadcast %cst_12 : f32 to vector<1x128xf32>
    %16 = arith.maximumf %15, %14 : vector<1x128xf32>
    %17 = vector.broadcast %cst_13 : f32 to vector<1x128xf32>
    %18 = arith.minimumf %17, %16 : vector<1x128xf32>
    %c0_14 = arith.constant 0 : index
    %c0_15 = arith.constant 0 : index
    %19 = vector.load %arg6[%c0_14, %c0_15] : memref<1x128xf32, #tpu.memory_space<vmem>>, vector<1x128xf32>
    tpu.vector_store %arg6[%c0_14, %c0_15], %18 {strides = array<i32>} : memref<1x128xf32, #tpu.memory_space<vmem>>, vector<1x128xf32>,
    return
  }
  func.func @transform_0(%arg0: i32) -> (i32, i32) {
    %c0_i32 = arith.constant 0 : i32
    %c0_i32_0 = arith.constant 0 : i32
    return %arg0, %c0_i32 : i32, i32
  }
  func.func @transform_1(%arg0: i32) -> (i32, i32) {
    %c0_i32 = arith.constant 0 : i32
    %c0_i32_0 = arith.constant 0 : i32
    %c0_i32_1 = arith.constant 0 : i32
    return %c0_i32, %c0_i32_0 : i32, i32
  }
  func.func @transform_2(%arg0: i32) -> (i32, i32) {
    %c0_i32 = arith.constant 0 : i32
    %c0_i32_0 = arith.constant 0 : i32
    %c0_i32_1 = arith.constant 0 : i32
    return %c0_i32, %c0_i32_0 : i32, i32
  }
  func.func @transform_3(%arg0: i32) -> (i32, i32) {
    %c0_i32 = arith.constant 0 : i32
    %c0_i32_0 = arith.constant 0 : i32
    %c0_i32_1 = arith.constant 0 : i32
    return %c0_i32, %c0_i32_0 : i32, i32
  }
  func.func @transform_4(%arg0: i32) -> (i32, i32) {
    %c0_i32 = arith.constant 0 : i32
    %c0_i32_0 = arith.constant 0 : i32
    %c0_i32_1 = arith.constant 0 : i32
    return %c0_i32, %c0_i32_0 : i32, i32
  }
  func.func @transform_5(%arg0: i32) -> (i32, i32) {
    %c0_i32 = arith.constant 0 : i32
    %c0_i32_0 = arith.constant 0 : i32
    return %c0_i32, %arg0 : i32, i32
  }
}

</mosaic_0001>

<bundles_post_ra>
// kernel: tpu_custom_call.1
= control target key start
LH: loop header
LB: loop body
LE: loop exit
PB: predicated region body
PF: predicated region fallthrough
CT: control target
= control target key end

     0   :  { %11 = vsyncpa [#allocation4], 0  ;;  %s1895_s0 = inlined_call_operand.hbm [shape: f32[128,1024], index: 0, kind: input, shape index: {}]   ;;  %s1896_s1 = inlined_call_operand.hbm [shape: f32[1024,128], index: 1, kind: input, shape index: {}]   ;;  %s1897_s2 = inlined_call_operand.vmem [shape: f32[1,128], index: 2, kind: input, shape index: {}]   ;;  %s1898_s3 = inlined_call_operand.vmem [shape: f32[1,128], index: 3, kind: input, shape index: {}]   ;;  %s1899_s4 = inlined_call_operand.<no memory space> [shape: f32[1,1], index: 4, kind: input, shape index: {}]   ;;  %s1900_s5 = inlined_call_operand.hbm [shape: f32[1,128], index: 5, kind: output, shape index: {}]  }
   0x1   :  { %12 = vsyncpa [#allocation7], 0 }
   0x2   :  { %13 = vsyncpa [#allocation5], 0  ;;  %s1736_s18 = smov [#allocation3]   ;;  %s1664_s22 = scalar_lea.hbm %s1895_s0, 16384 }
   0x3   :  { %s19_s19 = sshll.u32 %s1736_s18, 4  ;;  %p1665_p0 = scmp.ne.s32.totalorder %s1895_s0, %s1664_s22  ;;  %s20_s19 = int_to_ptr.vmem [resolvable:$true] %s19_s19 }
   0x4   :  { %p1668_p1 = scmp.lt.u32.totalorder %s1664_s22, %s1895_s0 }
   0x6   :  { %p1670_p2 = pnand %p1668_p1, %p1665_p0 }
   0x8   :  { %1673 = shalt.err (!%p1670_p2)
}
   0x9   :  { %s1674_s27 = scalar_lea.vmem %s20_s19, 16384  ;;  %p1679_p4 = scmp.lt.s32.totalorder %s20_s19, %s20_s19 }
   0xa   :  { %p1675_p3 = scmp.ne.s32.totalorder %s20_s19, %s1674_s27  ;;  %p1680_p5 = scmp.lt.s32.totalorder %s1674_s27, %s1674_s27 }
   0xc   :  { %p1681_p6 = por %p1680_p5, %p1679_p4 }
   0xe   :  { %p1682_p7 = pnand %p1681_p6, %p1675_p3 }
  0x10   :  { %1685 = shalt.err (!%p1682_p7)
}
  0x11   :  { %s1737_s28 = smov 1024   ;;  %s1738_s29 = smov 64  }
  0x12   :  { %25 = dma.hbm_to_vmem [thread:$0]  %s1895_s0, 16384, %s20_s19, [#allocation4], %s1737_s28, %s1737_s28, %s1738_s29  }
  0x13   :  { %s1739_s7 = smov [#allocation6]   ;;  %s1686_s11 = scalar_lea.hbm %s1896_s1, 16384 }
  0x14   :  { %s31_s8 = sshll.u32 %s1739_s7, 4  ;;  %p1687_p8 = scmp.ne.s32.totalorder %s1896_s1, %s1686_s11  ;;  %s32_s8 = int_to_ptr.vmem [resolvable:$true] %s31_s8 }
  0x15   :  { %p1690_p9 = scmp.lt.u32.totalorder %s1686_s11, %s1896_s1 }
  0x17   :  { %p1692_p10 = pnand %p1690_p9, %p1687_p8 }
  0x19   :  { %1695 = shalt.err (!%p1692_p10)
}
  0x1a   :  { %s1696_s16 = scalar_lea.vmem %s32_s8, 16384  ;;  %p1701_p12 = scmp.lt.s32.totalorder %s32_s8, %s32_s8 }
  0x1b   :  { %p1697_p11 = scmp.ne.s32.totalorder %s32_s8, %s1696_s16  ;;  %p1702_p13 = scmp.lt.s32.totalorder %s1696_s16, %s1696_s16 }
  0x1d   :  { %p1703_p0 = por %p1702_p13, %p1701_p12 }
  0x1f   :  { %p1704_p1 = pnand %p1703_p0, %p1697_p11 }
  0x21   :  { %1707 = shalt.err (!%p1704_p1)
}
  0x22   :  { %s1740_s0 = smov 128   ;;  %s1741_s17 = smov 8  }
  0x23   :  { %37 = dma.hbm_to_vmem [thread:$0]  %s1896_s1, 16384, %s32_s8, [#allocation7], %s1740_s0, %s1740_s0, %s1741_s17  }
  0x24   :  { %1730 = dma.done.wait [#allocation4], 16384  }
  0x25   :  { %1731 = vsyncadd [#allocation4], 4294950912 }
  0x26   :  { %1732 = dma.done.wait [#allocation7], 16384  }
  0x27   :  { %1733 = vsyncadd [#allocation7], 4294950912  ;;  %v322_v0 = vld [vmem:[#allocation6 + $0x80] sm:$0xff]  ;;  %v323_v1 = vld [vmem:[#allocation6 + $0x88] sm:$0xff]  ;;  %vm1743_vm0 = vmmov 0   ;;  %s1745_s24 = smov [#allocation8]  }
  0x28   :  { %v306_v2 = vld [vmem:[#allocation6] sm:$0xff]  ;;  %v1502_v3 = vpack.c.bf16 %v323_v1, %v322_v0  ;;  %v307_v4 = vld [vmem:[#allocation6 + $0x8] sm:$0xff]  ;;  %v324_v11 = vld [vmem:[#allocation6 + $0x90] sm:$0xff]  ;;  %s1119_s25 = sshll.u32 %s1745_s24, 4  ;;  %s1120_s25 = int_to_ptr.vmem [resolvable:$true] %s1119_s25 }
  0x29   :  { %v354_v5 = vld [vmem:[#allocation6 + $0x180] sm:$0xff]  ;;  %v355_v6 = vld [vmem:[#allocation6 + $0x188] sm:$0xff]  ;;  %v1504_v7 = vpack.c.bf16 %v307_v4, %v306_v2  ;;  %v325_v13 = vld [vmem:[#allocation6 + $0x98] sm:$0xff]  ;;  %s1708_s26 = scalar_lea.vmem %s1120_s25, 16  ;;  %s1712_s27 = scalar_lea.vmem %s1120_s25, 32 }
  0x2a   :  { %v1534_v8 = vpack.c.bf16 %v355_v6, %v354_v5  ;;  %v338_v9 = vld [vmem:[#allocation6 + $0x100] sm:$0xff]  ;;  %v339_v10 = vld [vmem:[#allocation6 + $0x108] sm:$0xff]  ;;  %1503 = vmatprep.subr.bf16.mxu0 %v1502_v3  ;;  %v308_v14 = vld [vmem:[#allocation6 + $0x10] sm:$0xff]  ;;  %v1506_v16 = vpack.c.bf16 %v325_v13, %v324_v11  ;;  %p1709_p2 = scmp.ne.s32.totalorder %s1120_s25, %s1708_s26  ;;  %p1713_p3 = scmp.lt.s32.totalorder %s1120_s25, %s1120_s25 }
  0x2b   :  { %v1536_v12 = vpack.c.bf16 %v339_v10, %v338_v9  ;;  %v309_v15 = vld [vmem:[#allocation6 + $0x18] sm:$0xff]  ;;  %1505 = vmatpush3.bf16.msra.mxu0 %v1504_v7  ;;  %v356_v18 = vld [vmem:[#allocation6 + $0x190] sm:$0xff]  ;;  %v326_v23 = vld [vmem:[#allocation6 + $0xa0] sm:$0xff]  ;;  %p1714_p4 = scmp.lt.s32.totalorder %s1712_s27, %s1708_s26 }
  0x2c   :  { %1535 = vmatprep.subr.bf16.mxu1 %v1534_v8  ;;  %v1508_v17 = vpack.c.bf16 %v309_v15, %v308_v14  ;;  %v357_v19 = vld [vmem:[#allocation6 + $0x198] sm:$0xff]  ;;  %v340_v20 = vld [vmem:[#allocation6 + $0x110] sm:$0xff]  ;;  %v327_v24 = vld [vmem:[#allocation6 + $0xa8] sm:$0xff]  ;;  %1507 = vmatprep.subr.bf16.mxu0 %v1506_v16 }
  0x2d   :  { %1537 = vmatpush3.bf16.msra.mxu1 %v1536_v12  ;;  %v1538_v21 = vpack.c.bf16 %v357_v19, %v356_v18  ;;  %v341_v22 = vld [vmem:[#allocation6 + $0x118] sm:$0xff]  ;;  %v1510_v26 = vpack.c.bf16 %v327_v24, %v326_v23  ;;  %v310_v27 = vld [vmem:[#allocation6 + $0x20] sm:$0xff]  ;;  %v311_v28 = vld [vmem:[#allocation6 + $0x28] sm:$0xff]  ;;  %p1715_p5 = por %p1714_p4, %p1713_p3 }
  0x2e   :  { %v1540_v25 = vpack.c.bf16 %v341_v22, %v340_v20  ;;  %v358_v29 = vld [vmem:[#allocation6 + $0x1a0] sm:$0xff]  ;;  %v359_v30 = vld [vmem:[#allocation6 + $0x1a8] sm:$0xff]  ;;  %v1512_v33 = vpack.c.bf16 %v311_v28, %v310_v27  ;;  %v328_v35 = vld [vmem:[#allocation6 + $0xb0] sm:$0xff] }
  0x2f   :  { %1539 = vmatprep.subr.bf16.mxu1 %v1538_v21  ;;  %v342_v31 = vld [vmem:[#allocation6 + $0x120] sm:$0xff]  ;;  %v343_v32 = vld [vmem:[#allocation6 + $0x128] sm:$0xff]  ;;  %1509 = vmatpush3.bf16.msra.mxu0 %v1508_v17  ;;  %v1542_v34 = vpack.c.bf16 %v359_v30, %v358_v29  ;;  %v329_v36 = vld [vmem:[#allocation6 + $0xb8] sm:$0xff]  ;;  %p1716_p6 = pnand %p1715_p5, %p1709_p2 }
  0x30   :  { %v312_v37 = vld [vmem:[#allocation6 + $0x30] sm:$0xff]  ;;  %1511 = vmatprep.subr.bf16.mxu0 %v1510_v26  ;;  %v1544_v38 = vpack.c.bf16 %v343_v32, %v342_v31  ;;  %v1514_v39 = vpack.c.bf16 %v329_v36, %v328_v35  ;;  %v313_v40 = vld [vmem:[#allocation6 + $0x38] sm:$0xff]  ;;  %v330_v46 = vld [vmem:[#allocation6 + $0xc0] sm:$0xff] }
  0x31   :  { %1541 = vmatpush3.bf16.msra.mxu1 %v1540_v25  ;;  %v360_v41 = vld [vmem:[#allocation6 + $0x1b0] sm:$0xff]  ;;  %v361_v42 = vld [vmem:[#allocation6 + $0x1b8] sm:$0xff]  ;;  %v331_v47 = vld [vmem:[#allocation6 + $0xc8] sm:$0xff]  ;;  %v1516_v48 = vpack.c.bf16 %v313_v40, %v312_v37 }
  0x32   :  { %1543 = vmatprep.subr.bf16.mxu1 %v1542_v34  ;;  %v1546_v43 = vpack.c.bf16 %v361_v42, %v360_v41  ;;  %v344_v44 = vld [vmem:[#allocation6 + $0x130] sm:$0xff]  ;;  %v345_v45 = vld [vmem:[#allocation6 + $0x138] sm:$0xff]  ;;  %v362_v49 = vld [vmem:[#allocation6 + $0x1c0] sm:$0xff]  ;;  %v1518_v52 = vpack.c.bf16 %v331_v47, %v330_v46 }
  0x33   :  { %1513 = vmatpush3.bf16.msra.mxu0 %v1512_v33  ;;  %v363_v50 = vld [vmem:[#allocation6 + $0x1c8] sm:$0xff]  ;;  %v1548_v51 = vpack.c.bf16 %v345_v45, %v344_v44  ;;  %v314_v53 = vld [vmem:[#allocation6 + $0x40] sm:$0xff]  ;;  %v332_v58 = vld [vmem:[#allocation6 + $0xd0] sm:$0xff] }
  0x34   :  { %1515 = vmatprep.subr.bf16.mxu0 %v1514_v39  ;;  %v315_v54 = vld [vmem:[#allocation6 + $0x48] sm:$0xff]  ;;  %v346_v55 = vld [vmem:[#allocation6 + $0x140] sm:$0xff]  ;;  %v1550_v56 = vpack.c.bf16 %v363_v50, %v362_v49  ;;  %v333_v59 = vld [vmem:[#allocation6 + $0xd8] sm:$0xff] }
  0x35   :  { %1545 = vmatpush3.bf16.msra.mxu1 %v1544_v38  ;;  %v347_v57 = vld [vmem:[#allocation6 + $0x148] sm:$0xff]  ;;  %v364_v60 = vld [vmem:[#allocation6 + $0x1d0] sm:$0xff]  ;;  %v365_v61 = vld [vmem:[#allocation6 + $0x1d8] sm:$0xff]  ;;  %v1520_v62 = vpack.c.bf16 %v315_v54, %v314_v53  ;;  %v1522_v0 = vpack.c.bf16 %v333_v59, %v332_v58 }
  0x36   :  { %1547 = vmatprep.subr.bf16.mxu1 %v1546_v43  ;;  %v1552_v63 = vpack.c.bf16 %v347_v57, %v346_v55  ;;  %v316_v1 = vld [vmem:[#allocation6 + $0x50] sm:$0xff]  ;;  %v317_v2 = vld [vmem:[#allocation6 + $0x58] sm:$0xff]  ;;  %v1554_v4 = vpack.c.bf16 %v365_v61, %v364_v60  ;;  %v334_v6 = vld [vmem:[#allocation6 + $0xe0] sm:$0xff] }
  0x37   :  { %1517 = vmatpush3.bf16.msra.mxu0 %v1516_v48  ;;  %v348_v3 = vld [vmem:[#allocation6 + $0x150] sm:$0xff]  ;;  %v349_v5 = vld [vmem:[#allocation6 + $0x158] sm:$0xff]  ;;  %v335_v7 = vld [vmem:[#allocation6 + $0xe8] sm:$0xff]  ;;  %v1524_v10 = vpack.c.bf16 %v317_v2, %v316_v1 }
  0x38   :  { %1519 = vmatprep.subr.bf16.mxu0 %v1518_v52  ;;  %v366_v8 = vld [vmem:[#allocation6 + $0x1e0] sm:$0xff]  ;;  %v367_v9 = vld [vmem:[#allocation6 + $0x1e8] sm:$0xff]  ;;  %v1556_v13 = vpack.c.bf16 %v349_v5, %v348_v3  ;;  %v1526_v14 = vpack.c.bf16 %v335_v7, %v334_v6  ;;  %v336_v19 = vld [vmem:[#allocation6 + $0xf0] sm:$0xff] }
  0x39   :  { %1549 = vmatpush3.bf16.msra.mxu1 %v1548_v51  ;;  %v318_v11 = vld [vmem:[#allocation6 + $0x60] sm:$0xff]  ;;  %v319_v12 = vld [vmem:[#allocation6 + $0x68] sm:$0xff]  ;;  %v1558_v18 = vpack.c.bf16 %v367_v9, %v366_v8  ;;  %v337_v20 = vld [vmem:[#allocation6 + $0xf8] sm:$0xff] }
  0x3a   :  { %1551 = vmatprep.subr.bf16.mxu1 %v1550_v56  ;;  %v350_v15 = vld [vmem:[#allocation6 + $0x160] sm:$0xff]  ;;  %v351_v16 = vld [vmem:[#allocation6 + $0x168] sm:$0xff]  ;;  %v53_v22 = vld [vmem:[#allocation3 + $0x18] sm:$0xff]  ;;  %v1528_v26 = vpack.c.bf16 %v319_v12, %v318_v11  ;;  %v1530_v28 = vpack.c.bf16 %v337_v20, %v336_v19 }
  0x3b   :  { %1521 = vmatpush3.bf16.msra.mxu0 %v1520_v62  ;;  %v51_v17 = vld [vmem:[#allocation3 + $0x8] sm:$0xff]  ;;  %v368_v23 = vld [vmem:[#allocation6 + $0x1f0] sm:$0xff]  ;;  %v369_v24 = vld [vmem:[#allocation6 + $0x1f8] sm:$0xff]  ;;  %v181_v25 = vmax.f32 %v53_v22, 0.0  ;;  %v1560_v27 = vpack.c.bf16 %v351_v16, %v350_v15 }
  0x3c   :  { %1523 = vmatprep.subr.bf16.mxu0 %v1522_v0  ;;  %v179_v21 = vmax.f32 %v51_v17, 0.0  ;;  %v320_v29 = vld [vmem:[#allocation6 + $0x70] sm:$0xff]  ;;  %v321_v30 = vld [vmem:[#allocation6 + $0x78] sm:$0xff]  ;;  %v1562_v32 = vpack.c.bf16 %v369_v24, %v368_v23  ;;  %v386_v34 = vld [vmem:[#allocation6 + $0x280] sm:$0xff] }
  0x3d   :  { %1553 = vmatpush3.bf16.msra.mxu1 %v1552_v63  ;;  %v352_v31 = vld [vmem:[#allocation6 + $0x170] sm:$0xff]  ;;  %v353_v33 = vld [vmem:[#allocation6 + $0x178] sm:$0xff]  ;;  %650 = vmatprep.mubr.f32.mxu1 %v181_v25  ;;  %v387_v35 = vld [vmem:[#allocation6 + $0x288] sm:$0xff]  ;;  %v1532_v38 = vpack.c.bf16 %v321_v30, %v320_v29 }
  0x3e   :  { %1555 = vmatprep.subr.bf16.mxu1 %v1554_v4  ;;  %505 = vmatprep.mubr.f32.mxu0 %v179_v21  ;;  %v418_v36 = vld [vmem:[#allocation6 + $0x380] sm:$0xff]  ;;  %v419_v37 = vld [vmem:[#allocation6 + $0x388] sm:$0xff]  ;;  %v1564_v40 = vpack.c.bf16 %v353_v33, %v352_v31  ;;  %v1566_v41 = vpack.c.bf16 %v387_v35, %v386_v34  ;;  %v52_v42 = vld [vmem:[#allocation3 + $0x10] sm:$0xff] }
  0x3f   :  { %1525 = vmatpush3.bf16.msra.mxu0 %v1524_v10  ;;  %v50_v39 = vld [vmem:[#allocation3] sm:$0xff]  ;;  %v371_v44 = vld [vmem:[#allocation6 + $0x208] sm:$0xff]  ;;  %v1598_v45 = vpack.c.bf16 %v419_v37, %v418_v36  ;;  %v61_v50 = vld [vmem:[#allocation3 + $0x58] sm:$0xff]  ;;  %v180_v53 = vmax.f32 %v52_v42, 0.0 }
  0x40   :  { %1527 = vmatprep.subr.bf16.mxu0 %v1526_v14  ;;  %v370_v43 = vld [vmem:[#allocation6 + $0x200] sm:$0xff]  ;;  %v59_v46 = vld [vmem:[#allocation3 + $0x48] sm:$0xff]  ;;  %v178_v49 = vmax.f32 %v50_v39, 0.0  ;;  %v388_v51 = vld [vmem:[#allocation6 + $0x290] sm:$0xff]  ;;  %v189_v63 = vmax.f32 %v61_v50, 0.0 }
  0x41   :  { %1557 = vmatpush3.bf16.msra.mxu1 %v1556_v13  ;;  %v402_v47 = vld [vmem:[#allocation6 + $0x300] sm:$0xff]  ;;  %v403_v48 = vld [vmem:[#allocation6 + $0x308] sm:$0xff]  ;;  %v389_v52 = vld [vmem:[#allocation6 + $0x298] sm:$0xff]  ;;  %v1568_v54 = vpack.c.bf16 %v371_v44, %v370_v43  ;;  %v187_v58 = vmax.f32 %v59_v46, 0.0 }
  0x42   :  { %1559 = vmatprep.subr.bf16.mxu1 %v1558_v18  ;;  %v58_v55 = vld [vmem:[#allocation3 + $0x40] sm:$0xff]  ;;  %v420_v56 = vld [vmem:[#allocation6 + $0x390] sm:$0xff]  ;;  %v421_v57 = vld [vmem:[#allocation6 + $0x398] sm:$0xff]  ;;  %v1600_v59 = vpack.c.bf16 %v403_v48, %v402_v47  ;;  %v1570_v0 = vpack.c.bf16 %v389_v52, %v388_v51 }
  0x43   :  { %1529 = vmatpush3.bf16.msra.mxu0 %v1528_v26  ;;  %v60_v60 = vld [vmem:[#allocation3 + $0x50] sm:$0xff]  ;;  %v67_v61 = vld [vmem:[#allocation3 + $0x88] sm:$0xff]  ;;  %v69_v62 = vld [vmem:[#allocation3 + $0x98] sm:$0xff]  ;;  %v186_v4 = vmax.f32 %v58_v55, 0.0  ;;  %v1602_v5 = vpack.c.bf16 %v421_v57, %v420_v56 }
  0x44   :  { %1531 = vmatprep.subr.bf16.mxu0 %v1530_v28  ;;  %v372_v1 = vld [vmem:[#allocation6 + $0x210] sm:$0xff]  ;;  %v373_v2 = vld [vmem:[#allocation6 + $0x218] sm:$0xff]  ;;  %v390_v7 = vld [vmem:[#allocation6 + $0x2a0] sm:$0xff]  ;;  %v188_v9 = vmax.f32 %v60_v60, 0.0  ;;  %v195_v10 = vmax.f32 %v67_v61, 0.0  ;;  %v197_v14 = vmax.f32 %v69_v62, 0.0 }
  0x45   :  { %1561 = vmatpush3.bf16.msra.mxu1 %v1560_v27  ;;  %v404_v3 = vld [vmem:[#allocation6 + $0x310] sm:$0xff]  ;;  %v405_v6 = vld [vmem:[#allocation6 + $0x318] sm:$0xff]  ;;  %v391_v8 = vld [vmem:[#allocation6 + $0x2a8] sm:$0xff]  ;;  %v1572_v16 = vpack.c.bf16 %v373_v2, %v372_v1 }
  0x46   :  { %1563 = vmatprep.subr.bf16.mxu1 %v1562_v32  ;;  %v66_v11 = vld [vmem:[#allocation3 + $0x80] sm:$0xff]  ;;  %v423_v13 = vld [vmem:[#allocation6 + $0x3a8] sm:$0xff]  ;;  %v68_v15 = vld [vmem:[#allocation3 + $0x90] sm:$0xff]  ;;  %v1604_v19 = vpack.c.bf16 %v405_v6, %v404_v3  ;;  %v1574_v20 = vpack.c.bf16 %v391_v8, %v390_v7 }
  0x47   :  { %1533 = vmatpush3.bf16.msra.mxu0 %v1532_v38  ;;  %v422_v12 = vld [vmem:[#allocation6 + $0x3a0] sm:$0xff]  ;;  %v75_v17 = vld [vmem:[#allocation3 + $0xc8] sm:$0xff]  ;;  %v77_v18 = vld [vmem:[#allocation3 + $0xd8] sm:$0xff]  ;;  %v194_v24 = vmax.f32 %v66_v11, 0.0  ;;  %v196_v29 = vmax.f32 %v68_v15, 0.0 }
  0x48   :  { %1567 = vmatprep.subr.bf16.mxu0 %v1566_v41  ;;  %v374_v21 = vld [vmem:[#allocation6 + $0x220] sm:$0xff]  ;;  %v375_v22 = vld [vmem:[#allocation6 + $0x228] sm:$0xff]  ;;  %v1606_v25 = vpack.c.bf16 %v423_v13, %v422_v12  ;;  %v392_v27 = vld [vmem:[#allocation6 + $0x2b0] sm:$0xff]  ;;  %v203_v30 = vmax.f32 %v75_v17, 0.0  ;;  %v205_v34 = vmax.f32 %v77_v18, 0.0 }
  0x49   :  { %1565 = vmatpush3.bf16.msra.mxu1 %v1564_v40  ;;  %v406_v23 = vld [vmem:[#allocation6 + $0x320] sm:$0xff]  ;;  %v407_v26 = vld [vmem:[#allocation6 + $0x328] sm:$0xff]  ;;  %v393_v28 = vld [vmem:[#allocation6 + $0x2b8] sm:$0xff]  ;;  %v1576_v37 = vpack.c.bf16 %v375_v22, %v374_v21 }
  0x4a   :  { %1599 = vmatprep.subr.bf16.mxu1 %v1598_v45  ;;  %506 = vmatmul.mubr.f32.vlgmr.msra.gmra.mrb[0].mxu0 %v178_v49  ;;  %v74_v31 = vld [vmem:[#allocation3 + $0xc0] sm:$0xff]  ;;  %v424_v32 = vld [vmem:[#allocation6 + $0x3b0] sm:$0xff]  ;;  %v425_v33 = vld [vmem:[#allocation6 + $0x3b8] sm:$0xff]  ;;  %v1608_v39 = vpack.c.bf16 %v407_v26, %v406_v23  ;;  %v1578_v40 = vpack.c.bf16 %v393_v28, %v392_v27 }
  0x4b   :  { %1569 = vmatpush3.bf16.msra.mxu0 %v1568_v54  ;;  %510 = vmatprep.mubr.f32.mxu0 %v187_v58  ;;  %v76_v35 = vld [vmem:[#allocation3 + $0xd0] sm:$0xff]  ;;  %v83_v36 = vld [vmem:[#allocation3 + $0x108] sm:$0xff]  ;;  %v85_v38 = vld [vmem:[#allocation3 + $0x118] sm:$0xff]  ;;  %v202_v43 = vmax.f32 %v74_v31, 0.0  ;;  %v1610_v44 = vpack.c.bf16 %v425_v33, %v424_v32 }
  0x4c   :  { %651 = vmatmul.mubr.f32.vlgmr.msra.gmra.mrb[0].mxu1 %v180_v53  ;;  %1571 = vmatprep.subr.bf16.mxu0 %v1570_v0  ;;  %v376_v41 = vld [vmem:[#allocation6 + $0x230] sm:$0xff]  ;;  %v377_v42 = vld [vmem:[#allocation6 + $0x238] sm:$0xff]  ;;  %v394_v47 = vld [vmem:[#allocation6 + $0x2c0] sm:$0xff]  ;;  %v204_v48 = vmax.f32 %v76_v35, 0.0  ;;  %v211_v49 = vmax.f32 %v83_v36, 0.0  ;;  %v213_v53 = vmax.f32 %v85_v38, 0.0 }
  0x4d   :  { %1601 = vmatpush3.bf16.msra.mxu1 %v1600_v59  ;;  %655 = vmatprep.mubr.f32.mxu1 %v189_v63  ;;  %v408_v45 = vld [vmem:[#allocation6 + $0x330] sm:$0xff]  ;;  %v409_v46 = vld [vmem:[#allocation6 + $0x338] sm:$0xff]  ;;  %v82_v50 = vld [vmem:[#allocation3 + $0x100] sm:$0xff]  ;;  %v1580_v55 = vpack.c.bf16 %v377_v42, %v376_v41 }
  0x4e   :  { %511 = vmatmul.mubr.f32.gmra.mrb[2].mxu0 %v186_v4  ;;  %1603 = vmatprep.subr.bf16.mxu1 %v1602_v5  ;;  %v84_v51 = vld [vmem:[#allocation3 + $0x110] sm:$0xff]  ;;  %v395_v52 = vld [vmem:[#allocation6 + $0x2c8] sm:$0xff]  ;;  %v426_v56 = vld [vmem:[#allocation6 + $0x3c0] sm:$0xff]  ;;  %v1612_v59 = vpack.c.bf16 %v409_v46, %v408_v45  ;;  %v210_v63 = vmax.f32 %v82_v50, 0.0 }
  0x4f   :  { %515 = vmatprep.mubr.f32.mxu0 %v195_v10  ;;  %1573 = vmatpush3.bf16.msra.mxu0 %v1572_v16  ;;  %v91_v54 = vld [vmem:[#allocation3 + $0x148] sm:$0xff]  ;;  %v93_v58 = vld [vmem:[#allocation3 + $0x158] sm:$0xff]  ;;  %v1582_v60 = vpack.c.bf16 %v395_v52, %v394_v47  ;;  %v378_v61 = vld [vmem:[#allocation6 + $0x240] sm:$0xff]  ;;  %v212_v3 = vmax.f32 %v84_v51, 0.0 }
  0x50   :  { %656 = vmatmul.mubr.f32.gmra.mrb[2].mxu1 %v188_v9  ;;  %1575 = vmatprep.subr.bf16.mxu0 %v1574_v20  ;;  %v427_v57 = vld [vmem:[#allocation6 + $0x3c8] sm:$0xff]  ;;  %v410_v1 = vld [vmem:[#allocation6 + $0x340] sm:$0xff]  ;;  %v219_v4 = vmax.f32 %v91_v54, 0.0  ;;  %v92_v6 = vld [vmem:[#allocation3 + $0x150] sm:$0xff]  ;;  %v221_v8 = vmax.f32 %v93_v58, 0.0 }
  0x51   :  { %660 = vmatprep.mubr.f32.mxu1 %v197_v14  ;;  %1605 = vmatpush3.bf16.msra.mxu1 %v1604_v19  ;;  %v379_v62 = vld [vmem:[#allocation6 + $0x248] sm:$0xff]  ;;  %v1614_v0 = vpack.c.bf16 %v427_v57, %v426_v56  ;;  %v90_v5 = vld [vmem:[#allocation3 + $0x140] sm:$0xff]  ;;  %v101_v9 = vld [vmem:[#allocation3 + $0x198] sm:$0xff]  ;;  %v220_v21 = vmax.f32 %v92_v6, 0.0 }
  0x52   :  { %516 = vmatmul.mubr.f32.gmra.mrb[4].mxu0 %v194_v24  ;;  %1607 = vmatprep.subr.bf16.mxu1 %v1606_v25  ;;  %v411_v2 = vld [vmem:[#allocation6 + $0x348] sm:$0xff]  ;;  %v1584_v10 = vpack.c.bf16 %v379_v62, %v378_v61  ;;  %v396_v11 = vld [vmem:[#allocation6 + $0x2d0] sm:$0xff]  ;;  %v397_v12 = vld [vmem:[#allocation6 + $0x2d8] sm:$0xff]  ;;  %v218_v18 = vmax.f32 %v90_v5, 0.0  ;;  %v229_v26 = vmax.f32 %v101_v9, 0.0 }
  0x53   :  { %520 = vmatprep.mubr.f32.mxu0 %v203_v30  ;;  %1577 = vmatpush3.bf16.msra.mxu0 %v1576_v37  ;;  %v99_v7 = vld [vmem:[#allocation3 + $0x188] sm:$0xff]  ;;  %v1616_v13 = vpack.c.bf16 %v411_v2, %v410_v1  ;;  %v1586_v14 = vpack.c.bf16 %v397_v12, %v396_v11  ;;  %v380_v15 = vld [vmem:[#allocation6 + $0x250] sm:$0xff]  ;;  %v381_v16 = vld [vmem:[#allocation6 + $0x258] sm:$0xff] }
  0x54   :  { %661 = vmatmul.mubr.f32.gmra.mrb[4].mxu1 %v196_v29  ;;  %1579 = vmatprep.subr.bf16.mxu0 %v1578_v40  ;;  %v428_v17 = vld [vmem:[#allocation6 + $0x3d0] sm:$0xff]  ;;  %v429_v19 = vld [vmem:[#allocation6 + $0x3d8] sm:$0xff]  ;;  %v227_v22 = vmax.f32 %v99_v7, 0.0  ;;  %v98_v23 = vld [vmem:[#allocation3 + $0x180] sm:$0xff]  ;;  %v1588_v29 = vpack.c.bf16 %v381_v16, %v380_v15 }
  0x55   :  { %665 = vmatprep.mubr.f32.mxu1 %v205_v34  ;;  %1609 = vmatpush3.bf16.msra.mxu1 %v1608_v39  ;;  %v412_v20 = vld [vmem:[#allocation6 + $0x350] sm:$0xff]  ;;  %v1618_v24 = vpack.c.bf16 %v429_v19, %v428_v17  ;;  %v413_v25 = vld [vmem:[#allocation6 + $0x358] sm:$0xff]  ;;  %v107_v28 = vld [vmem:[#allocation3 + $0x1c8] sm:$0xff]  ;;  %v226_v34 = vmax.f32 %v98_v23, 0.0 }
  0x56   :  { %521 = vmatmul.mubr.f32.gmra.mrb[6].mxu0 %v202_v43  ;;  %1611 = vmatprep.subr.bf16.mxu1 %v1610_v44  ;;  %v100_v27 = vld [vmem:[#allocation3 + $0x190] sm:$0xff]  ;;  %v109_v30 = vld [vmem:[#allocation3 + $0x1d8] sm:$0xff]  ;;  %v1620_v31 = vpack.c.bf16 %v413_v25, %v412_v20  ;;  %v398_v32 = vld [vmem:[#allocation6 + $0x2e0] sm:$0xff]  ;;  %v235_v40 = vmax.f32 %v107_v28, 0.0 }
  0x57   :  { %525 = vmatprep.mubr.f32.mxu0 %v211_v49  ;;  %1581 = vmatpush3.bf16.msra.mxu0 %v1580_v55  ;;  %v399_v33 = vld [vmem:[#allocation6 + $0x2e8] sm:$0xff]  ;;  %v106_v35 = vld [vmem:[#allocation3 + $0x1c0] sm:$0xff]  ;;  %v228_v39 = vmax.f32 %v100_v27, 0.0  ;;  %v108_v41 = vld [vmem:[#allocation3 + $0x1d0] sm:$0xff]  ;;  %v237_v44 = vmax.f32 %v109_v30, 0.0 }
  0x58   :  { %666 = vmatmul.mubr.f32.gmra.mrb[6].mxu1 %v204_v48  ;;  %1583 = vmatprep.subr.bf16.mxu0 %v1582_v60  ;;  %v1590_v36 = vpack.c.bf16 %v399_v33, %v398_v32  ;;  %v382_v37 = vld [vmem:[#allocation6 + $0x260] sm:$0xff]  ;;  %v383_v38 = vld [vmem:[#allocation6 + $0x268] sm:$0xff]  ;;  %v117_v50 = vld [vmem:[#allocation3 + $0x218] sm:$0xff]  ;;  %v234_v52 = vmax.f32 %v106_v35, 0.0  ;;  %v236_v56 = vmax.f32 %v108_v41, 0.0 }
  0x59   :  { %670 = vmatprep.mubr.f32.mxu1 %v213_v53  ;;  %1613 = vmatpush3.bf16.msra.mxu1 %v1612_v59  ;;  %v430_v42 = vld [vmem:[#allocation6 + $0x3e0] sm:$0xff]  ;;  %v431_v43 = vld [vmem:[#allocation6 + $0x3e8] sm:$0xff]  ;;  %v1592_v46 = vpack.c.bf16 %v383_v38, %v382_v37  ;;  %v116_v54 = vld [vmem:[#allocation3 + $0x210] sm:$0xff]  ;;  %v245_v61 = vmax.f32 %v117_v50, 0.0 }
  0x5a   :  { %526 = vmatmul.mubr.f32.gmra.mrb[8].mxu0 %v210_v63  ;;  %1615 = vmatprep.subr.bf16.mxu1 %v1614_v0  ;;  %v115_v45 = vld [vmem:[#allocation3 + $0x208] sm:$0xff]  ;;  %v1622_v47 = vpack.c.bf16 %v431_v43, %v430_v42  ;;  %v414_v48 = vld [vmem:[#allocation6 + $0x360] sm:$0xff]  ;;  %v400_v55 = vld [vmem:[#allocation6 + $0x2f0] sm:$0xff]  ;;  %v244_v9 = vmax.f32 %v116_v54, 0.0 }
  0x5b   :  { %530 = vmatprep.mubr.f32.mxu0 %v219_v4  ;;  %1585 = vmatpush3.bf16.msra.mxu0 %v1584_v10  ;;  %v415_v49 = vld [vmem:[#allocation6 + $0x368] sm:$0xff]  ;;  %v114_v53 = vld [vmem:[#allocation3 + $0x200] sm:$0xff]  ;;  %v243_v57 = vmax.f32 %v115_v45, 0.0  ;;  %v401_v59 = vld [vmem:[#allocation6 + $0x2f8] sm:$0xff] }
  0x5c   :  { %671 = vmatmul.mubr.f32.gmra.mrb[8].mxu1 %v212_v3  ;;  %1587 = vmatprep.subr.bf16.mxu0 %v1586_v14  ;;  %v1624_v51 = vpack.c.bf16 %v415_v49, %v414_v48  ;;  %v123_v58 = vld [vmem:[#allocation3 + $0x248] sm:$0xff]  ;;  %v384_v60 = vld [vmem:[#allocation6 + $0x270] sm:$0xff]  ;;  %v1594_v62 = vpack.c.bf16 %v401_v59, %v400_v55  ;;  %v385_v63 = vld [vmem:[#allocation6 + $0x278] sm:$0xff]  ;;  %v242_v7 = vmax.f32 %v114_v53, 0.0 }
  0x5d   :  { %675 = vmatprep.mubr.f32.mxu1 %v221_v8  ;;  %1617 = vmatpush3.bf16.msra.mxu1 %v1616_v13  ;;  %v432_v0 = vld [vmem:[#allocation6 + $0x3f0] sm:$0xff]  ;;  %v433_v1 = vld [vmem:[#allocation6 + $0x3f8] sm:$0xff]  ;;  %v1596_v3 = vpack.c.bf16 %v385_v63, %v384_v60  ;;  %v251_v10 = vmax.f32 %v123_v58, 0.0  ;;  %v122_v11 = vld [vmem:[#allocation3 + $0x240] sm:$0xff] }
  0x5e   :  { %531 = vmatmul.mubr.f32.gmra.mrb[10].mxu0 %v218_v18  ;;  %1619 = vmatprep.subr.bf16.mxu1 %v1618_v24  ;;  %v125_v2 = vld [vmem:[#allocation3 + $0x258] sm:$0xff]  ;;  %v1626_v4 = vpack.c.bf16 %v433_v1, %v432_v0  ;;  %v416_v5 = vld [vmem:[#allocation6 + $0x370] sm:$0xff]  ;;  %v131_v14 = vld [vmem:[#allocation3 + $0x288] sm:$0xff]  ;;  %v250_v16 = vmax.f32 %v122_v11, 0.0 }
  0x5f   :  { %535 = vmatprep.mubr.f32.mxu0 %v227_v22  ;;  %1589 = vmatpush3.bf16.msra.mxu0 %v1588_v29  ;;  %v417_v6 = vld [vmem:[#allocation6 + $0x378] sm:$0xff]  ;;  %v253_v12 = vmax.f32 %v125_v2, 0.0  ;;  %v124_v13 = vld [vmem:[#allocation3 + $0x250] sm:$0xff]  ;;  %v259_v18 = vmax.f32 %v131_v14, 0.0  ;;  %v130_v19 = vld [vmem:[#allocation3 + $0x280] sm:$0xff] }
  0x60   :  { %676 = vmatmul.mubr.f32.gmra.mrb[10].mxu1 %v220_v21  ;;  %1591 = vmatprep.subr.bf16.mxu0 %v1590_v36  ;;  %v1628_v8 = vpack.c.bf16 %v417_v6, %v416_v5  ;;  %v133_v15 = vld [vmem:[#allocation3 + $0x298] sm:$0xff]  ;;  %v252_v17 = vmax.f32 %v124_v13, 0.0  ;;  %v132_v21 = vld [vmem:[#allocation3 + $0x290] sm:$0xff]  ;;  %v139_v22 = vld [vmem:[#allocation3 + $0x2c8] sm:$0xff]  ;;  %v258_v24 = vmax.f32 %v130_v19, 0.0 }
  0x61   :  { %680 = vmatprep.mubr.f32.mxu1 %v229_v26  ;;  %1621 = vmatpush3.bf16.msra.mxu1 %v1620_v31  ;;  %v261_v20 = vmax.f32 %v133_v15, 0.0  ;;  %v141_v23 = vld [vmem:[#allocation3 + $0x2d8] sm:$0xff]  ;;  %v260_v25 = vmax.f32 %v132_v21, 0.0  ;;  %v267_v26 = vmax.f32 %v139_v22, 0.0  ;;  %v138_v27 = vld [vmem:[#allocation3 + $0x2c0] sm:$0xff]  ;;  %v140_v29 = vld [vmem:[#allocation3 + $0x2d0] sm:$0xff] }
  0x62   :  { %536 = vmatmul.mubr.f32.gmra.mrb[12].mxu0 %v226_v34  ;;  %1623 = vmatprep.subr.bf16.mxu1 %v1622_v47  ;;  %v269_v28 = vmax.f32 %v141_v23, 0.0  ;;  %v147_v30 = vld [vmem:[#allocation3 + $0x308] sm:$0xff]  ;;  %v149_v31 = vld [vmem:[#allocation3 + $0x318] sm:$0xff]  ;;  %v266_v32 = vmax.f32 %v138_v27, 0.0  ;;  %v268_v33 = vmax.f32 %v140_v29, 0.0  ;;  %v146_v35 = vld [vmem:[#allocation3 + $0x300] sm:$0xff] }
  0x63   :  { %540 = vmatprep.mubr.f32.mxu0 %v235_v40  ;;  %1593 = vmatpush3.bf16.msra.mxu0 %v1592_v46  ;;  %v275_v34 = vmax.f32 %v147_v30, 0.0  ;;  %v277_v36 = vmax.f32 %v149_v31, 0.0  ;;  %v148_v37 = vld [vmem:[#allocation3 + $0x310] sm:$0xff]  ;;  %v155_v38 = vld [vmem:[#allocation3 + $0x348] sm:$0xff]  ;;  %v274_v40 = vmax.f32 %v146_v35, 0.0  ;;  %v154_v43 = vld [vmem:[#allocation3 + $0x340] sm:$0xff] }
  0x64   :  { %681 = vmatmul.mubr.f32.gmra.mrb[12].mxu1 %v228_v39  ;;  %1595 = vmatprep.subr.bf16.mxu0 %v1594_v62  ;;  %v157_v39 = vld [vmem:[#allocation3 + $0x358] sm:$0xff]  ;;  %v276_v41 = vmax.f32 %v148_v37, 0.0  ;;  %v283_v42 = vmax.f32 %v155_v38, 0.0  ;;  %v156_v45 = vld [vmem:[#allocation3 + $0x350] sm:$0xff]  ;;  %v163_v46 = vld [vmem:[#allocation3 + $0x388] sm:$0xff]  ;;  %v282_v48 = vmax.f32 %v154_v43, 0.0 }
  0x65   :  { %685 = vmatprep.mubr.f32.mxu1 %v237_v44  ;;  %1625 = vmatpush3.bf16.msra.mxu1 %v1624_v51  ;;  %v285_v44 = vmax.f32 %v157_v39, 0.0  ;;  %v165_v47 = vld [vmem:[#allocation3 + $0x398] sm:$0xff]  ;;  %v284_v49 = vmax.f32 %v156_v45, 0.0  ;;  %v291_v50 = vmax.f32 %v163_v46, 0.0  ;;  %v162_v51 = vld [vmem:[#allocation3 + $0x380] sm:$0xff]  ;;  %v164_v53 = vld [vmem:[#allocation3 + $0x390] sm:$0xff] }
  0x66   :  { %541 = vmatmul.mubr.f32.gmra.mrb[14].mxu0 %v234_v52  ;;  %1627 = vmatprep.subr.bf16.mxu1 %v1626_v4  ;;  %v293_v52 = vmax.f32 %v165_v47, 0.0  ;;  %v171_v54 = vld [vmem:[#allocation3 + $0x3c8] sm:$0xff]  ;;  %v173_v55 = vld [vmem:[#allocation3 + $0x3d8] sm:$0xff]  ;;  %v170_v59 = vld [vmem:[#allocation3 + $0x3c0] sm:$0xff] }
  0x67   :  { %545 = vmatprep.mubr.f32.mxu0 %v243_v57  ;;  %1597 = vmatpush3.bf16.msra.mxu0 %v1596_v3  ;;  %v292_v57 = vmax.f32 %v164_v53, 0.0  ;;  %v299_v58 = vmax.f32 %v171_v54, 0.0  ;;  %v301_v60 = vmax.f32 %v173_v55, 0.0  ;;  %v55_v62 = vld [vmem:[#allocation3 + $0x28] sm:$0xff]  ;;  %v57_v63 = vld [vmem:[#allocation3 + $0x38] sm:$0xff]  ;;  %v298_v0 = vmax.f32 %v170_v59, 0.0 }
  0x68   :  { %686 = vmatmul.mubr.f32.gmra.mrb[14].mxu1 %v236_v56  ;;  %v290_v56 = vmax.f32 %v162_v51, 0.0  ;;  %v183_v2 = vmax.f32 %v55_v62, 0.0  ;;  %v54_v3 = vld [vmem:[#allocation3 + $0x20] sm:$0xff]  ;;  %v185_v4 = vmax.f32 %v57_v63, 0.0  ;;  %v56_v5 = vld [vmem:[#allocation3 + $0x30] sm:$0xff]  ;;  %v63_v6 = vld [vmem:[#allocation3 + $0x68] sm:$0xff] }
  0x69   :  { %690 = vmatprep.mubr.f32.mxu1 %v245_v61  ;;  %1629 = vmatpush3.bf16.msra.mxu1 %v1628_v8  ;;  %v172_v61 = vld [vmem:[#allocation3 + $0x3d0] sm:$0xff]  ;;  %v182_v8 = vmax.f32 %v54_v3, 0.0  ;;  %v62_v11 = vld [vmem:[#allocation3 + $0x60] sm:$0xff]  ;;  %v71_v14 = vld [vmem:[#allocation3 + $0xa8] sm:$0xff] }
  0x6a   :  { %546 = vmatmul.mubr.f32.gmra.mrb[16].mxu0 %v242_v7  ;;  %v300_v1 = vmax.f32 %v172_v61, 0.0  ;;  %v65_v7 = vld [vmem:[#allocation3 + $0x78] sm:$0xff]  ;;  %v64_v13 = vld [vmem:[#allocation3 + $0x70] sm:$0xff]  ;;  %v70_v19 = vld [vmem:[#allocation3 + $0xa0] sm:$0xff] }
  0x6b   :  { %550 = vmatprep.mubr.f32.mxu0 %v251_v10  ;;  %v191_v10 = vmax.f32 %v63_v6, 0.0  ;;  %v73_v15 = vld [vmem:[#allocation3 + $0xb8] sm:$0xff]  ;;  %v72_v21 = vld [vmem:[#allocation3 + $0xb0] sm:$0xff]  ;;  %v79_v22 = vld [vmem:[#allocation3 + $0xe8] sm:$0xff] }
  0x6c   :  { %691 = vmatmul.mubr.f32.gmra.mrb[16].mxu1 %v244_v9  ;;  %v184_v9 = vmax.f32 %v56_v5, 0.0  ;;  %v81_v23 = vld [vmem:[#allocation3 + $0xf8] sm:$0xff]  ;;  %v78_v27 = vld [vmem:[#allocation3 + $0xe0] sm:$0xff]  ;;  %v80_v29 = vld [vmem:[#allocation3 + $0xf0] sm:$0xff] }
  0x6d   :  { %695 = vmatprep.mubr.f32.mxu1 %v253_v12  ;;  %v193_v12 = vmax.f32 %v65_v7, 0.0  ;;  %v87_v30 = vld [vmem:[#allocation3 + $0x128] sm:$0xff]  ;;  %v89_v31 = vld [vmem:[#allocation3 + $0x138] sm:$0xff]  ;;  %v86_v35 = vld [vmem:[#allocation3 + $0x120] sm:$0xff] }
  0x6e   :  { %551 = vmatmul.mubr.f32.gmra.mrb[18].mxu0 %v250_v16  ;;  %v190_v16 = vmax.f32 %v62_v11, 0.0  ;;  %v88_v37 = vld [vmem:[#allocation3 + $0x130] sm:$0xff]  ;;  %v95_v38 = vld [vmem:[#allocation3 + $0x168] sm:$0xff]  ;;  %v97_v39 = vld [vmem:[#allocation3 + $0x178] sm:$0xff] }
  0x6f   :  { %555 = vmatprep.mubr.f32.mxu0 %v259_v18  ;;  %v199_v18 = vmax.f32 %v71_v14, 0.0  ;;  %v94_v43 = vld [vmem:[#allocation3 + $0x160] sm:$0xff]  ;;  %v96_v45 = vld [vmem:[#allocation3 + $0x170] sm:$0xff]  ;;  %v103_v46 = vld [vmem:[#allocation3 + $0x1a8] sm:$0xff] }
  0x70   :  { %696 = vmatmul.mubr.f32.gmra.mrb[18].mxu1 %v252_v17  ;;  %v192_v17 = vmax.f32 %v64_v13, 0.0  ;;  %v105_v47 = vld [vmem:[#allocation3 + $0x1b8] sm:$0xff]  ;;  %v102_v51 = vld [vmem:[#allocation3 + $0x1a0] sm:$0xff]  ;;  %v104_v53 = vld [vmem:[#allocation3 + $0x1b0] sm:$0xff] }
  0x71   :  { %700 = vmatprep.mubr.f32.mxu1 %v261_v20  ;;  %v201_v20 = vmax.f32 %v73_v15, 0.0  ;;  %v111_v54 = vld [vmem:[#allocation3 + $0x1e8] sm:$0xff]  ;;  %v113_v55 = vld [vmem:[#allocation3 + $0x1f8] sm:$0xff]  ;;  %v110_v59 = vld [vmem:[#allocation3 + $0x1e0] sm:$0xff] }
  0x72   :  { %556 = vmatmul.mubr.f32.gmra.mrb[20].mxu0 %v258_v24  ;;  %v198_v24 = vmax.f32 %v70_v19, 0.0  ;;  %v112_v61 = vld [vmem:[#allocation3 + $0x1f0] sm:$0xff]  ;;  %v119_v62 = vld [vmem:[#allocation3 + $0x228] sm:$0xff]  ;;  %v121_v63 = vld [vmem:[#allocation3 + $0x238] sm:$0xff] }
  0x73   :  { %560 = vmatprep.mubr.f32.mxu0 %v267_v26  ;;  %v207_v26 = vmax.f32 %v79_v22, 0.0  ;;  %v118_v3 = vld [vmem:[#allocation3 + $0x220] sm:$0xff]  ;;  %v120_v5 = vld [vmem:[#allocation3 + $0x230] sm:$0xff]  ;;  %v127_v6 = vld [vmem:[#allocation3 + $0x268] sm:$0xff] }
  0x74   :  { %701 = vmatmul.mubr.f32.gmra.mrb[20].mxu1 %v260_v25  ;;  %v200_v25 = vmax.f32 %v72_v21, 0.0  ;;  %v129_v7 = vld [vmem:[#allocation3 + $0x278] sm:$0xff]  ;;  %v126_v11 = vld [vmem:[#allocation3 + $0x260] sm:$0xff]  ;;  %v128_v13 = vld [vmem:[#allocation3 + $0x270] sm:$0xff] }
  0x75   :  { %705 = vmatprep.mubr.f32.mxu1 %v269_v28  ;;  %v209_v28 = vmax.f32 %v81_v23, 0.0  ;;  %v135_v14 = vld [vmem:[#allocation3 + $0x2a8] sm:$0xff]  ;;  %v137_v15 = vld [vmem:[#allocation3 + $0x2b8] sm:$0xff]  ;;  %v134_v19 = vld [vmem:[#allocation3 + $0x2a0] sm:$0xff] }
  0x76   :  { %561 = vmatmul.mubr.f32.gmra.mrb[22].mxu0 %v266_v32  ;;  %v206_v32 = vmax.f32 %v78_v27, 0.0  ;;  %v136_v21 = vld [vmem:[#allocation3 + $0x2b0] sm:$0xff]  ;;  %v143_v22 = vld [vmem:[#allocation3 + $0x2e8] sm:$0xff]  ;;  %v145_v23 = vld [vmem:[#allocation3 + $0x2f8] sm:$0xff] }
  0x77   :  { %565 = vmatprep.mubr.f32.mxu0 %v275_v34  ;;  %v215_v34 = vmax.f32 %v87_v30, 0.0  ;;  %v142_v27 = vld [vmem:[#allocation3 + $0x2e0] sm:$0xff]  ;;  %v151_v30 = vld [vmem:[#allocation3 + $0x328] sm:$0xff] }
  0x78   :  { %706 = vmatmul.mubr.f32.gmra.mrb[22].mxu1 %v268_v33  ;;  %v208_v33 = vmax.f32 %v80_v29, 0.0  ;;  %v144_v29 = vld [vmem:[#allocation3 + $0x2f0] sm:$0xff] }
  0x79   :  { %710 = vmatprep.mubr.f32.mxu1 %v277_v36  ;;  %v217_v36 = vmax.f32 %v89_v31, 0.0  ;;  %v153_v31 = vld [vmem:[#allocation3 + $0x338] sm:$0xff] }
  0x7a   :  { %566 = vmatmul.mubr.f32.gmra.mrb[24].mxu0 %v274_v40  ;;  %v214_v40 = vmax.f32 %v86_v35, 0.0  ;;  %v150_v35 = vld [vmem:[#allocation3 + $0x320] sm:$0xff] }
  0x7b   :  { %570 = vmatprep.mubr.f32.mxu0 %v283_v42  ;;  %v223_v42 = vmax.f32 %v95_v38, 0.0  ;;  %v159_v38 = vld [vmem:[#allocation3 + $0x368] sm:$0xff] }
  0x7c   :  { %711 = vmatmul.mubr.f32.gmra.mrb[24].mxu1 %v276_v41  ;;  %v216_v41 = vmax.f32 %v88_v37, 0.0  ;;  %v152_v37 = vld [vmem:[#allocation3 + $0x330] sm:$0xff] }
  0x7d   :  { %715 = vmatprep.mubr.f32.mxu1 %v285_v44  ;;  %v225_v44 = vmax.f32 %v97_v39, 0.0  ;;  %v161_v39 = vld [vmem:[#allocation3 + $0x378] sm:$0xff] }
  0x7e   :  { %571 = vmatmul.mubr.f32.gmra.mrb[26].mxu0 %v282_v48  ;;  %v222_v48 = vmax.f32 %v94_v43, 0.0  ;;  %v158_v43 = vld [vmem:[#allocation3 + $0x360] sm:$0xff] }
  0x7f   :  { %575 = vmatprep.mubr.f32.mxu0 %v291_v50  ;;  %v231_v50 = vmax.f32 %v103_v46, 0.0  ;;  %v167_v46 = vld [vmem:[#allocation3 + $0x3a8] sm:$0xff] }
  0x80   :  { %716 = vmatmul.mubr.f32.gmra.mrb[26].mxu1 %v284_v49  ;;  %v224_v49 = vmax.f32 %v96_v45, 0.0  ;;  %v160_v45 = vld [vmem:[#allocation3 + $0x370] sm:$0xff] }
  0x81   :  { %720 = vmatprep.mubr.f32.mxu1 %v293_v52  ;;  %v233_v52 = vmax.f32 %v105_v47, 0.0  ;;  %v169_v47 = vld [vmem:[#allocation3 + $0x3b8] sm:$0xff] }
  0x82   :  { %576 = vmatmul.mubr.f32.gmra.mrb[28].mxu0 %v290_v56  ;;  %v230_v56 = vmax.f32 %v102_v51, 0.0  ;;  %v166_v51 = vld [vmem:[#allocation3 + $0x3a0] sm:$0xff] }
  0x83   :  { %580 = vmatprep.mubr.f32.mxu0 %v299_v58  ;;  %v239_v58 = vmax.f32 %v111_v54, 0.0  ;;  %v175_v54 = vld [vmem:[#allocation3 + $0x3e8] sm:$0xff] }
  0x84   :  { %721 = vmatmul.mubr.f32.gmra.mrb[28].mxu1 %v292_v57  ;;  %v232_v57 = vmax.f32 %v104_v53, 0.0  ;;  %v168_v53 = vld [vmem:[#allocation3 + $0x3b0] sm:$0xff] }
  0x85   :  { %725 = vmatprep.mubr.f32.mxu1 %v301_v60  ;;  %v241_v60 = vmax.f32 %v113_v55, 0.0  ;;  %v177_v55 = vld [vmem:[#allocation3 + $0x3f8] sm:$0xff] }
  0x86   :  { %581 = vmatmul.mubr.f32.gmra.mrb[30].mxu0 %v298_v0  ;;  %v238_v0 = vmax.f32 %v110_v59, 0.0  ;;  %v174_v59 = vld [vmem:[#allocation3 + $0x3e0] sm:$0xff] }
  0x87   :  { %795 = vmatprep.mubr.f32.mxu0 %v183_v2  ;;  %v247_v2 = vmax.f32 %v119_v62, 0.0  ;;  %v302_v62 = vmax.f32 %v174_v59, 0.0 }
  0x88   :  { %726 = vmatmul.mubr.f32.gmra.mrb[30].mxu1 %v300_v1  ;;  %v240_v1 = vmax.f32 %v112_v61, 0.0  ;;  %v176_v61 = vld [vmem:[#allocation3 + $0x3f0] sm:$0xff] }
  0x89   :  { %940 = vmatprep.mubr.f32.mxu1 %v185_v4  ;;  %v249_v4 = vmax.f32 %v121_v63, 0.0  ;;  %v304_v63 = vmax.f32 %v176_v61, 0.0 }
  0x8a   :  { %796 = vmatmul.mubr.f32.vlgmr.msra.gmra.mrb[32].mxu0 %v182_v8  ;;  %v246_v8 = vmax.f32 %v118_v3, 0.0 }
  0x8b   :  { %800 = vmatprep.mubr.f32.mxu0 %v191_v10  ;;  %v255_v10 = vmax.f32 %v127_v6, 0.0 }
  0x8c   :  { %941 = vmatmul.mubr.f32.vlgmr.msra.gmra.mrb[32].mxu1 %v184_v9  ;;  %v248_v9 = vmax.f32 %v120_v5, 0.0 }
  0x8d   :  { %945 = vmatprep.mubr.f32.mxu1 %v193_v12  ;;  %v257_v12 = vmax.f32 %v129_v7, 0.0 }
  0x8e   :  { %801 = vmatmul.mubr.f32.gmra.mrb[34].mxu0 %v190_v16  ;;  %v254_v16 = vmax.f32 %v126_v11, 0.0 }
  0x8f   :  { %805 = vmatprep.mubr.f32.mxu0 %v199_v18  ;;  %v263_v18 = vmax.f32 %v135_v14, 0.0 }
  0x90   :  { %946 = vmatmul.mubr.f32.gmra.mrb[34].mxu1 %v192_v17  ;;  %v256_v17 = vmax.f32 %v128_v13, 0.0 }
  0x91   :  { %950 = vmatprep.mubr.f32.mxu1 %v201_v20  ;;  %v265_v20 = vmax.f32 %v137_v15, 0.0 }
  0x92   :  { %806 = vmatmul.mubr.f32.gmra.mrb[36].mxu0 %v198_v24  ;;  %v262_v24 = vmax.f32 %v134_v19, 0.0 }
  0x93   :  { %810 = vmatprep.mubr.f32.mxu0 %v207_v26  ;;  %v271_v26 = vmax.f32 %v143_v22, 0.0 }
  0x94   :  { %951 = vmatmul.mubr.f32.gmra.mrb[36].mxu1 %v200_v25  ;;  %v264_v25 = vmax.f32 %v136_v21, 0.0 }
  0x95   :  { %955 = vmatprep.mubr.f32.mxu1 %v209_v28  ;;  %v273_v28 = vmax.f32 %v145_v23, 0.0 }
  0x96   :  { %811 = vmatmul.mubr.f32.gmra.mrb[38].mxu0 %v206_v32  ;;  %v270_v32 = vmax.f32 %v142_v27, 0.0 }
  0x97   :  { %815 = vmatprep.mubr.f32.mxu0 %v215_v34  ;;  %v279_v34 = vmax.f32 %v151_v30, 0.0 }
  0x98   :  { %956 = vmatmul.mubr.f32.gmra.mrb[38].mxu1 %v208_v33  ;;  %v272_v33 = vmax.f32 %v144_v29, 0.0 }
  0x99   :  { %960 = vmatprep.mubr.f32.mxu1 %v217_v36  ;;  %v281_v36 = vmax.f32 %v153_v31, 0.0 }
  0x9a   :  { %816 = vmatmul.mubr.f32.gmra.mrb[40].mxu0 %v214_v40  ;;  %v278_v40 = vmax.f32 %v150_v35, 0.0 }
  0x9b   :  { %820 = vmatprep.mubr.f32.mxu0 %v223_v42  ;;  %v287_v42 = vmax.f32 %v159_v38, 0.0 }
  0x9c   :  { %961 = vmatmul.mubr.f32.gmra.mrb[40].mxu1 %v216_v41  ;;  %v280_v41 = vmax.f32 %v152_v37, 0.0 }
  0x9d   :  { %965 = vmatprep.mubr.f32.mxu1 %v225_v44  ;;  %v289_v44 = vmax.f32 %v161_v39, 0.0 }
  0x9e   :  { %821 = vmatmul.mubr.f32.gmra.mrb[42].mxu0 %v222_v48  ;;  %v286_v48 = vmax.f32 %v158_v43, 0.0 }
  0x9f   :  { %825 = vmatprep.mubr.f32.mxu0 %v231_v50  ;;  %v295_v50 = vmax.f32 %v167_v46, 0.0 }
  0xa0   :  { %966 = vmatmul.mubr.f32.gmra.mrb[42].mxu1 %v224_v49  ;;  %v288_v49 = vmax.f32 %v160_v45, 0.0 }
  0xa1   :  { %970 = vmatprep.mubr.f32.mxu1 %v233_v52  ;;  %v297_v52 = vmax.f32 %v169_v47, 0.0 }
  0xa2   :  { %826 = vmatmul.mubr.f32.gmra.mrb[44].mxu0 %v230_v56  ;;  %v294_v56 = vmax.f32 %v166_v51, 0.0 }
  0xa3   :  { %830 = vmatprep.mubr.f32.mxu0 %v239_v58  ;;  %v303_v58 = vmax.f32 %v175_v54, 0.0 }
  0xa4   :  { %971 = vmatmul.mubr.f32.gmra.mrb[44].mxu1 %v232_v57  ;;  %v296_v57 = vmax.f32 %v168_v53, 0.0 }
  0xa5   :  { %975 = vmatprep.mubr.f32.mxu1 %v241_v60  ;;  %v305_v60 = vmax.f32 %v177_v55, 0.0 }
  0xa6   :  { %831 = vmatmul.mubr.f32.gmra.mrb[46].mxu0 %v238_v0  ;;  %v1742_v0 = vmov 0.0|0.0  }
  0xa7   :  { %835 = vmatprep.mubr.f32.mxu0 %v247_v2  ;;  %1630 = vmatprep.subr.bf16.mxu0 %v1742_v0  ;;  %v1804_v2 = vld [vmem:[%s1897_s2] ss:$0 sm:$0xff] }
  0xa8   :  { %976 = vmatmul.mubr.f32.gmra.mrb[46].mxu1 %v240_v1 }
  0xa9   :  { %980 = vmatprep.mubr.f32.mxu1 %v249_v4 }
  0xaa   :  { %836 = vmatmul.mubr.f32.gmra.mrb[48].mxu0 %v246_v8 }
  0xab   :  { %840 = vmatprep.mubr.f32.mxu0 %v255_v10 }
  0xac   :  { %981 = vmatmul.mubr.f32.gmra.mrb[48].mxu1 %v248_v9 }
  0xad   :  { %985 = vmatprep.mubr.f32.mxu1 %v257_v12 }
  0xae   :  { %841 = vmatmul.mubr.f32.gmra.mrb[50].mxu0 %v254_v16 }
  0xaf   :  { %845 = vmatprep.mubr.f32.mxu0 %v263_v18 }
  0xb0   :  { %986 = vmatmul.mubr.f32.gmra.mrb[50].mxu1 %v256_v17 }
  0xb1   :  { %990 = vmatprep.mubr.f32.mxu1 %v265_v20  ;;  %v1744_v20 = vmov 0.0  }
  0xb2   :  { %846 = vmatmul.mubr.f32.gmra.mrb[52].mxu0 %v262_v24 }
  0xb3   :  { %850 = vmatprep.mubr.f32.mxu0 %v271_v26 }
  0xb4   :  { %991 = vmatmul.mubr.f32.gmra.mrb[52].mxu1 %v264_v25 }
  0xb5   :  { %995 = vmatprep.mubr.f32.mxu1 %v273_v28 }
  0xb6   :  { %851 = vmatmul.mubr.f32.gmra.mrb[54].mxu0 %v270_v32 }
  0xb7   :  { %855 = vmatprep.mubr.f32.mxu0 %v279_v34 }
  0xb8   :  { %996 = vmatmul.mubr.f32.gmra.mrb[54].mxu1 %v272_v33 }
  0xb9   :  { %1000 = vmatprep.mubr.f32.mxu1 %v281_v36 }
  0xba   :  { %856 = vmatmul.mubr.f32.gmra.mrb[56].mxu0 %v278_v40 }
  0xbb   :  { %860 = vmatprep.mubr.f32.mxu0 %v287_v42 }
  0xbc   :  { %1001 = vmatmul.mubr.f32.gmra.mrb[56].mxu1 %v280_v41 }
  0xbd   :  { %1005 = vmatprep.mubr.f32.mxu1 %v289_v44 }
  0xbe   :  { %861 = vmatmul.mubr.f32.gmra.mrb[58].mxu0 %v286_v48 }
  0xbf   :  { %865 = vmatprep.mubr.f32.mxu0 %v295_v50 }
  0xc0   :  { %1006 = vmatmul.mubr.f32.gmra.mrb[58].mxu1 %v288_v49 }
  0xc1   :  { %1010 = vmatprep.mubr.f32.mxu1 %v297_v52 }
  0xc2   :  { %866 = vmatmul.mubr.f32.gmra.mrb[60].mxu0 %v294_v56 }
  0xc3   :  { %870 = vmatprep.mubr.f32.mxu0 %v303_v58 }
  0xc4   :  { %1011 = vmatmul.mubr.f32.gmra.mrb[60].mxu1 %v296_v57 }
  0xc5   :  { %1015 = vmatprep.mubr.f32.mxu1 %v305_v60 }
  0xc6   :  { %871 = vmatmul.mubr.f32.gmra.mrb[62].mxu0 %v302_v62 }
  0xc7   :  { %1499 = vmatprep.mubr.msk.f32.mxu0 %vm1743_vm0, %v1744_v20 }
  0xc8   :  { %1016 = vmatmul.mubr.f32.gmra.mrb[62].mxu1 %v304_v63 }
 0x11d   :  { %v1162_v1 = vpop.f32.mrb[0].mxu0 }
 0x11e   :  { %v1163_v3 = vpop.f32.mrb[1].mxu0 }
 0x11f   :  { %v1242_v4 = vpop.f32.mrb[0].mxu1  ;;  %v1164_v5 = vadd.f32 %v1163_v3, %v1162_v1 }
 0x120   :  { %v1243_v6 = vpop.f32.mrb[1].mxu1 }
 0x121   :  { %v1244_v7 = vadd.f32 %v1243_v6, %v1242_v4  ;;  %v508_v8 = vadd.f32 %v1164_v5, %v1804_v2  ;;  %v1165_v9 = vpop.f32.mrb[2].mxu0 }
 0x122   :  { %v1166_v10 = vpop.f32.mrb[3].mxu0 }
 0x123   :  { %v1245_v11 = vpop.f32.mrb[2].mxu1  ;;  %v1807_v12 = vadd.f32 %v1244_v7, %v508_v8  ;;  %v1167_v13 = vadd.f32 %v1166_v10, %v1165_v9 }
 0x124   :  { %v1246_v14 = vpop.f32.mrb[3].mxu1 }
 0x125   :  { %v1247_v15 = vadd.f32 %v1246_v14, %v1245_v11  ;;  %v513_v16 = vadd.f32 %v1167_v13, %v1804_v2  ;;  %v1168_v17 = vpop.f32.mrb[4].mxu0 }
 0x126   :  { %v1169_v18 = vpop.f32.mrb[5].mxu0 }
 0x127   :  { %v1248_v19 = vpop.f32.mrb[4].mxu1  ;;  %v1810_v21 = vadd.f32 %v1247_v15, %v513_v16  ;;  %v1170_v22 = vadd.f32 %v1169_v18, %v1168_v17 }
 0x128   :  { %v1249_v23 = vpop.f32.mrb[5].mxu1 }
 0x129   :  { %v1250_v24 = vadd.f32 %v1249_v23, %v1248_v19  ;;  %v518_v25 = vadd.f32 %v1170_v22, %v1804_v2  ;;  %v1171_v26 = vpop.f32.mrb[6].mxu0 }
 0x12a   :  { %v1172_v27 = vpop.f32.mrb[7].mxu0 }
 0x12b   :  { %v1251_v28 = vpop.f32.mrb[6].mxu1  ;;  %v1813_v29 = vadd.f32 %v1250_v24, %v518_v25  ;;  %v1173_v30 = vadd.f32 %v1172_v27, %v1171_v26 }
 0x12c   :  { %v1252_v31 = vpop.f32.mrb[7].mxu1 }
 0x12d   :  { %v1253_v32 = vadd.f32 %v1252_v31, %v1251_v28  ;;  %v523_v33 = vadd.f32 %v1173_v30, %v1804_v2  ;;  %v1174_v34 = vpop.f32.mrb[8].mxu0 }
 0x12e   :  { %v1175_v35 = vpop.f32.mrb[9].mxu0 }
 0x12f   :  { %v1254_v36 = vpop.f32.mrb[8].mxu1  ;;  %v1816_v37 = vadd.f32 %v1253_v32, %v523_v33  ;;  %v1176_v38 = vadd.f32 %v1175_v35, %v1174_v34 }
 0x130   :  { %v1255_v39 = vpop.f32.mrb[9].mxu1 }
 0x131   :  { %v1256_v40 = vadd.f32 %v1255_v39, %v1254_v36  ;;  %v528_v41 = vadd.f32 %v1176_v38, %v1804_v2  ;;  %v1177_v42 = vpop.f32.mrb[10].mxu0 }
 0x132   :  { %v1178_v43 = vpop.f32.mrb[11].mxu0 }
 0x133   :  { %v1257_v44 = vpop.f32.mrb[10].mxu1  ;;  %v1819_v45 = vadd.f32 %v1256_v40, %v528_v41  ;;  %v1179_v46 = vadd.f32 %v1178_v43, %v1177_v42 }
 0x134   :  { %v1258_v47 = vpop.f32.mrb[11].mxu1 }
 0x135   :  { %v1259_v48 = vadd.f32 %v1258_v47, %v1257_v44  ;;  %v533_v49 = vadd.f32 %v1179_v46, %v1804_v2  ;;  %v1180_v50 = vpop.f32.mrb[12].mxu0 }
 0x136   :  { %v1181_v51 = vpop.f32.mrb[13].mxu0 }
 0x137   :  { %v1260_v52 = vpop.f32.mrb[12].mxu1  ;;  %v1822_v53 = vadd.f32 %v1259_v48, %v533_v49  ;;  %v1182_v54 = vadd.f32 %v1181_v51, %v1180_v50 }
 0x138   :  { %v1261_v55 = vpop.f32.mrb[13].mxu1 }
 0x139   :  { %v1262_v56 = vadd.f32 %v1261_v55, %v1260_v52  ;;  %v538_v57 = vadd.f32 %v1182_v54, %v1804_v2  ;;  %v1183_v58 = vpop.f32.mrb[14].mxu0 }
 0x13a   :  { %v1184_v59 = vpop.f32.mrb[15].mxu0 }
 0x13b   :  { %v1263_v60 = vpop.f32.mrb[14].mxu1  ;;  %v1825_v61 = vadd.f32 %v1262_v56, %v538_v57  ;;  %v1185_v62 = vadd.f32 %v1184_v59, %v1183_v58 }
 0x13c   :  { %v1264_v63 = vpop.f32.mrb[15].mxu1 }
 0x13d   :  { %v1265_v1 = vadd.f32 %v1264_v63, %v1263_v60  ;;  %v543_v3 = vadd.f32 %v1185_v62, %v1804_v2  ;;  %v1186_v4 = vpop.f32.mrb[16].mxu0 }
 0x13e   :  { %v1187_v5 = vpop.f32.mrb[17].mxu0 }
 0x13f   :  { %v1266_v6 = vpop.f32.mrb[16].mxu1  ;;  %v1828_v7 = vadd.f32 %v1265_v1, %v543_v3  ;;  %v1188_v8 = vadd.f32 %v1187_v5, %v1186_v4 }
 0x140   :  { %v1267_v9 = vpop.f32.mrb[17].mxu1 }
 0x141   :  { %v1268_v10 = vadd.f32 %v1267_v9, %v1266_v6  ;;  %v548_v11 = vadd.f32 %v1188_v8, %v1804_v2  ;;  %v1189_v13 = vpop.f32.mrb[18].mxu0 }
 0x142   :  { %v1190_v14 = vpop.f32.mrb[19].mxu0 }
 0x143   :  { %v1269_v15 = vpop.f32.mrb[18].mxu1  ;;  %v1831_v16 = vadd.f32 %v1268_v10, %v548_v11  ;;  %v1191_v17 = vadd.f32 %v1190_v14, %v1189_v13 }
 0x144   :  { %v1270_v18 = vpop.f32.mrb[19].mxu1 }
 0x145   :  { %v1271_v19 = vadd.f32 %v1270_v18, %v1269_v15  ;;  %v553_v20 = vadd.f32 %v1191_v17, %v1804_v2  ;;  %v1192_v22 = vpop.f32.mrb[20].mxu0 }
 0x146   :  { %v1193_v23 = vpop.f32.mrb[21].mxu0 }
 0x147   :  { %v1272_v24 = vpop.f32.mrb[20].mxu1  ;;  %v1834_v25 = vadd.f32 %v1271_v19, %v553_v20  ;;  %v1194_v26 = vadd.f32 %v1193_v23, %v1192_v22 }
 0x148   :  { %v1273_v27 = vpop.f32.mrb[21].mxu1 }
 0x149   :  { %v1274_v28 = vadd.f32 %v1273_v27, %v1272_v24  ;;  %v558_v30 = vadd.f32 %v1194_v26, %v1804_v2  ;;  %v1195_v31 = vpop.f32.mrb[22].mxu0 }
 0x14a   :  { %v1196_v32 = vpop.f32.mrb[23].mxu0 }
 0x14b   :  { %v1275_v33 = vpop.f32.mrb[22].mxu1  ;;  %v1837_v34 = vadd.f32 %v1274_v28, %v558_v30  ;;  %v1197_v35 = vadd.f32 %v1196_v32, %v1195_v31 }
 0x14c   :  { %v1276_v36 = vpop.f32.mrb[23].mxu1 }
 0x14d   :  { %v1277_v38 = vadd.f32 %v1276_v36, %v1275_v33  ;;  %v563_v39 = vadd.f32 %v1197_v35, %v1804_v2  ;;  %v1198_v40 = vpop.f32.mrb[24].mxu0 }
 0x14e   :  { %v1199_v41 = vpop.f32.mrb[25].mxu0 }
 0x14f   :  { %v1278_v42 = vpop.f32.mrb[24].mxu1  ;;  %v1840_v43 = vadd.f32 %v1277_v38, %v563_v39  ;;  %v1200_v44 = vadd.f32 %v1199_v41, %v1198_v40 }
 0x150   :  { %v1279_v46 = vpop.f32.mrb[25].mxu1 }
 0x151   :  { %v1280_v47 = vadd.f32 %v1279_v46, %v1278_v42  ;;  %v568_v48 = vadd.f32 %v1200_v44, %v1804_v2  ;;  %v1201_v49 = vpop.f32.mrb[26].mxu0 }
 0x152   :  { %v1202_v50 = vpop.f32.mrb[27].mxu0 }
 0x153   :  { %v1281_v51 = vpop.f32.mrb[26].mxu1  ;;  %v1843_v52 = vadd.f32 %v1280_v47, %v568_v48  ;;  %v1203_v54 = vadd.f32 %v1202_v50, %v1201_v49 }
 0x154   :  { %v1282_v55 = vpop.f32.mrb[27].mxu1 }
 0x155   :  { %v1283_v56 = vadd.f32 %v1282_v55, %v1281_v51  ;;  %v573_v57 = vadd.f32 %v1203_v54, %v1804_v2  ;;  %v1204_v58 = vpop.f32.mrb[28].mxu0 }
 0x156   :  { %v1205_v59 = vpop.f32.mrb[29].mxu0 }
 0x157   :  { %v1284_v60 = vpop.f32.mrb[28].mxu1  ;;  %v1846_v62 = vadd.f32 %v1283_v56, %v573_v57  ;;  %v1206_v63 = vadd.f32 %v1205_v59, %v1204_v58 }
 0x158   :  { %v1285_v1 = vpop.f32.mrb[29].mxu1 }
 0x159   :  { %v1286_v3 = vadd.f32 %v1285_v1, %v1284_v60  ;;  %v578_v4 = vadd.f32 %v1206_v63, %v1804_v2  ;;  %v1207_v5 = vpop.f32.mrb[30].mxu0 }
 0x15a   :  { %v1208_v6 = vpop.f32.mrb[31].mxu0 }
 0x15b   :  { %v1287_v8 = vpop.f32.mrb[30].mxu1  ;;  %v1849_v9 = vadd.f32 %v1286_v3, %v578_v4  ;;  %v1209_v10 = vadd.f32 %v1208_v6, %v1207_v5 }
 0x15c   :  { %v1288_v11 = vpop.f32.mrb[31].mxu1 }
 0x15d   :  { %v1289_v13 = vadd.f32 %v1288_v11, %v1287_v8  ;;  %v583_v14 = vadd.f32 %v1209_v10, %v1804_v2  ;;  %v1322_v15 = vpop.f32.mrb[32].mxu0 }
 0x15e   :  { %v1323_v17 = vpop.f32.mrb[33].mxu0 }
 0x15f   :  { %v1402_v18 = vpop.f32.mrb[32].mxu1  ;;  %v1852_v19 = vadd.f32 %v1289_v13, %v583_v14  ;;  %v1324_v20 = vadd.f32 %v1323_v17, %v1322_v15 }
 0x160   :  { %v1403_v22 = vpop.f32.mrb[33].mxu1 }
 0x161   :  { %v1404_v23 = vadd.f32 %v1403_v22, %v1402_v18  ;;  %v798_v24 = vadd.f32 %v1324_v20, %v1807_v12  ;;  %v1325_v26 = vpop.f32.mrb[34].mxu0 }
 0x162   :  { %v1326_v27 = vpop.f32.mrb[35].mxu0 }
 0x163   :  { %v1405_v28 = vpop.f32.mrb[34].mxu1  ;;  %v943_v30 = vadd.f32 %v1404_v23, %v798_v24  ;;  %v1327_v31 = vadd.f32 %v1326_v27, %v1325_v26 }
 0x164   :  { %v1406_v32 = vpop.f32.mrb[35].mxu1 }
 0x165   :  { %v1407_v33 = vadd.f32 %v1406_v32, %v1405_v28  ;;  %v803_v35 = vadd.f32 %v1327_v31, %v1810_v21  ;;  %v1328_v2 = vpop.f32.mrb[36].mxu0  ;;  %v1021_v44 = vmax.f32 %v943_v30, 0.0 }
 0x166   :  { %v1329_v36 = vpop.f32.mrb[37].mxu0 }
 0x167   :  { %v1408_v38 = vpop.f32.mrb[36].mxu1  ;;  %v948_v39 = vadd.f32 %v1407_v33, %v803_v35  ;;  %v1330_v40 = vadd.f32 %v1329_v36, %v1328_v2 }
 0x168   :  { %v1409_v41 = vpop.f32.mrb[37].mxu1 }
 0x169   :  { %v1410_v42 = vadd.f32 %v1409_v41, %v1408_v38  ;;  %v1022_v46 = vmax.f32 %v948_v39, 0.0  ;;  %v808_v12 = vadd.f32 %v1330_v40, %v1813_v29  ;;  %v1331_v47 = vpop.f32.mrb[38].mxu0 }
 0x16a   :  { %v1332_v48 = vpop.f32.mrb[39].mxu0 }
 0x16b   :  { %v1411_v49 = vpop.f32.mrb[38].mxu1  ;;  %v1631_v50 = vpack.c.bf16 %v1022_v46, %v1021_v44  ;;  %v953_v51 = vadd.f32 %v1410_v42, %v808_v12  ;;  %v1333_v54 = vadd.f32 %v1332_v48, %v1331_v47 }
 0x16c   :  { %v1412_v55 = vpop.f32.mrb[39].mxu1 }
 0x16d   :  { %v1413_v56 = vadd.f32 %v1412_v55, %v1411_v49  ;;  %v813_v21 = vadd.f32 %v1333_v54, %v1816_v37  ;;  %v1334_v57 = vpop.f32.mrb[40].mxu0  ;;  %1632 = vmatpush3.bf16.xpose.msra.mxu0 %v1631_v50  ;;  %v1023_v3 = vmax.f32 %v953_v51, 0.0 }
 0x16e   :  { %v1335_v58 = vpop.f32.mrb[41].mxu0  ;;  %1633 = vmatprep.subr.bf16.mxu0 %v1742_v0 }
 0x16f   :  { %v1414_v59 = vpop.f32.mrb[40].mxu1  ;;  %v958_v60 = vadd.f32 %v1413_v56, %v813_v21  ;;  %v1336_v63 = vadd.f32 %v1335_v58, %v1334_v57 }
 0x170   :  { %v1415_v1 = vpop.f32.mrb[41].mxu1 }
 0x171   :  { %v1416_v29 = vadd.f32 %v1415_v1, %v1414_v59  ;;  %v1024_v4 = vmax.f32 %v958_v60, 0.0  ;;  %v818_v5 = vadd.f32 %v1336_v63, %v1819_v45  ;;  %v1337_v6 = vpop.f32.mrb[42].mxu0 }
 0x172   :  { %v1338_v8 = vpop.f32.mrb[43].mxu0 }
 0x173   :  { %v1417_v10 = vpop.f32.mrb[42].mxu1  ;;  %v1634_v11 = vpack.c.bf16 %v1024_v4, %v1023_v3  ;;  %v963_v13 = vadd.f32 %v1416_v29, %v818_v5  ;;  %v1339_v37 = vadd.f32 %v1338_v8, %v1337_v6 }
 0x174   :  { %v1418_v14 = vpop.f32.mrb[43].mxu1 }
 0x175   :  { %v1419_v15 = vadd.f32 %v1418_v14, %v1417_v10  ;;  %v823_v17 = vadd.f32 %v1339_v37, %v1822_v53  ;;  %v1340_v18 = vpop.f32.mrb[44].mxu0  ;;  %1635 = vmatpush3.bf16.xpose.msra.mxu0 %v1634_v11  ;;  %v1025_v27 = vmax.f32 %v963_v13, 0.0 }
 0x176   :  { %v1341_v20 = vpop.f32.mrb[45].mxu0  ;;  %1636 = vmatprep.subr.bf16.mxu0 %v1742_v0 }
 0x177   :  { %v1420_v22 = vpop.f32.mrb[44].mxu1  ;;  %v968_v23 = vadd.f32 %v1419_v15, %v823_v17  ;;  %v1342_v24 = vadd.f32 %v1341_v20, %v1340_v18 }
 0x178   :  { %v1421_v26 = vpop.f32.mrb[45].mxu1 }
 0x179   :  { %v1422_v45 = vadd.f32 %v1421_v26, %v1420_v22  ;;  %v1026_v28 = vmax.f32 %v968_v23, 0.0  ;;  %v828_v30 = vadd.f32 %v1342_v24, %v1825_v61  ;;  %v1343_v31 = vpop.f32.mrb[46].mxu0 }
 0x17a   :  { %v1344_v32 = vpop.f32.mrb[47].mxu0 }
 0x17b   :  { %v1423_v33 = vpop.f32.mrb[46].mxu1  ;;  %v1637_v35 = vpack.c.bf16 %v1026_v28, %v1025_v27  ;;  %v973_v2 = vadd.f32 %v1422_v45, %v828_v30  ;;  %v1345_v53 = vadd.f32 %v1344_v32, %v1343_v31 }
 0x17c   :  { %v1424_v36 = vpop.f32.mrb[47].mxu1 }
 0x17d   :  { %v1425_v38 = vadd.f32 %v1424_v36, %v1423_v33  ;;  %v833_v39 = vadd.f32 %v1345_v53, %v1828_v7  ;;  %v1346_v40 = vpop.f32.mrb[48].mxu0  ;;  %1638 = vmatpush3.bf16.xpose.msra.mxu0 %v1637_v35  ;;  %v1027_v47 = vmax.f32 %v973_v2, 0.0 }
 0x17e   :  { %v1347_v41 = vpop.f32.mrb[49].mxu0  ;;  %1639 = vmatprep.subr.bf16.mxu0 %v1742_v0 }
 0x17f   :  { %v1426_v42 = vpop.f32.mrb[48].mxu1  ;;  %v978_v44 = vadd.f32 %v1425_v38, %v833_v39  ;;  %v1348_v46 = vadd.f32 %v1347_v41, %v1346_v40 }
 0x180   :  { %v1427_v12 = vpop.f32.mrb[49].mxu1 }
 0x181   :  { %v1428_v61 = vadd.f32 %v1427_v12, %v1426_v42  ;;  %v1028_v48 = vmax.f32 %v978_v44, 0.0  ;;  %v838_v49 = vadd.f32 %v1348_v46, %v1831_v16  ;;  %v1349_v50 = vpop.f32.mrb[50].mxu0 }
 0x182   :  { %v1350_v51 = vpop.f32.mrb[51].mxu0 }
 0x183   :  { %v1429_v54 = vpop.f32.mrb[50].mxu1  ;;  %v1640_v55 = vpack.c.bf16 %v1028_v48, %v1027_v47  ;;  %v983_v56 = vadd.f32 %v1428_v61, %v838_v49  ;;  %v1351_v7 = vadd.f32 %v1350_v51, %v1349_v50 }
 0x184   :  { %v1430_v21 = vpop.f32.mrb[51].mxu1 }
 0x185   :  { %v1431_v57 = vadd.f32 %v1430_v21, %v1429_v54  ;;  %v843_v58 = vadd.f32 %v1351_v7, %v1834_v25  ;;  %v1352_v59 = vpop.f32.mrb[52].mxu0  ;;  %1641 = vmatpush3.bf16.xpose.msra.mxu0 %v1640_v55  ;;  %v1029_v4 = vmax.f32 %v983_v56, 0.0 }
 0x186   :  { %v1353_v60 = vpop.f32.mrb[53].mxu0  ;;  %1642 = vmatprep.subr.bf16.mxu0 %v1742_v0 }
 0x187   :  { %v1432_v63 = vpop.f32.mrb[52].mxu1  ;;  %v988_v1 = vadd.f32 %v1431_v57, %v843_v58  ;;  %v1354_v29 = vadd.f32 %v1353_v60, %v1352_v59  ;;  %v1039_v59 = vstv %s1899_s4 }
 0x188   :  { %v1433_v3 = vpop.f32.mrb[53].mxu1 }
 0x189   :  { %v1434_v16 = vadd.f32 %v1433_v3, %v1432_v63  ;;  %v1030_v5 = vmax.f32 %v988_v1, 0.0  ;;  %v848_v6 = vadd.f32 %v1354_v29, %v1837_v34  ;;  %v1355_v8 = vpop.f32.mrb[54].mxu0 }
 0x18a   :  { %v1356_v10 = vpop.f32.mrb[55].mxu0 }
 0x18b   :  { %v1435_v11 = vpop.f32.mrb[54].mxu1  ;;  %v1643_v13 = vpack.c.bf16 %v1030_v5, %v1029_v4  ;;  %v993_v37 = vadd.f32 %v1434_v16, %v848_v6  ;;  %v1357_v25 = vadd.f32 %v1356_v10, %v1355_v8 }
 0x18c   :  { %v1436_v14 = vpop.f32.mrb[55].mxu1 }
 0x18d   :  { %v1437_v15 = vadd.f32 %v1436_v14, %v1435_v11  ;;  %v853_v17 = vadd.f32 %v1357_v25, %v1840_v43  ;;  %v1358_v18 = vpop.f32.mrb[56].mxu0  ;;  %1644 = vmatpush3.bf16.xpose.msra.mxu0 %v1643_v13  ;;  %v1031_v45 = vmax.f32 %v993_v37, 0.0 }
 0x18e   :  { %v1359_v20 = vpop.f32.mrb[57].mxu0  ;;  %1645 = vmatprep.subr.bf16.mxu0 %v1742_v0 }
 0x18f   :  { %v1438_v22 = vpop.f32.mrb[56].mxu1  ;;  %v998_v23 = vadd.f32 %v1437_v15, %v853_v17  ;;  %v1360_v24 = vadd.f32 %v1359_v20, %v1358_v18 }
 0x190   :  { %v1439_v26 = vpop.f32.mrb[57].mxu1 }
 0x191   :  { %v1440_v34 = vadd.f32 %v1439_v26, %v1438_v22  ;;  %v1032_v27 = vmax.f32 %v998_v23, 0.0  ;;  %v858_v28 = vadd.f32 %v1360_v24, %v1843_v52  ;;  %v1361_v30 = vpop.f32.mrb[58].mxu0 }
 0x192   :  { %v1362_v31 = vpop.f32.mrb[59].mxu0 }
 0x193   :  { %v1441_v32 = vpop.f32.mrb[58].mxu1  ;;  %v1646_v33 = vpack.c.bf16 %v1032_v27, %v1031_v45  ;;  %v1003_v35 = vadd.f32 %v1440_v34, %v858_v28  ;;  %v1363_v43 = vadd.f32 %v1362_v31, %v1361_v30 }
 0x194   :  { %v1442_v2 = vpop.f32.mrb[59].mxu1 }
 0x195   :  { %v1443_v53 = vadd.f32 %v1442_v2, %v1441_v32  ;;  %v863_v36 = vadd.f32 %v1363_v43, %v1846_v62  ;;  %v1364_v38 = vpop.f32.mrb[60].mxu0  ;;  %1647 = vmatpush3.bf16.xpose.msra.mxu0 %v1646_v33  ;;  %v1033_v46 = vmax.f32 %v1003_v35, 0.0 }
 0x196   :  { %v1365_v39 = vpop.f32.mrb[61].mxu0  ;;  %1648 = vmatprep.subr.bf16.mxu0 %v1742_v0 }
 0x197   :  { %v1444_v40 = vpop.f32.mrb[60].mxu1  ;;  %v1008_v41 = vadd.f32 %v1443_v53, %v863_v36  ;;  %v1366_v42 = vadd.f32 %v1365_v39, %v1364_v38 }
 0x198   :  { %v1445_v44 = vpop.f32.mrb[61].mxu1 }
 0x199   :  { %v1446_v52 = vadd.f32 %v1445_v44, %v1444_v40  ;;  %v1034_v12 = vmax.f32 %v1008_v41, 0.0  ;;  %v868_v61 = vadd.f32 %v1366_v42, %v1849_v9  ;;  %v1367_v47 = vpop.f32.mrb[62].mxu0  ;;  %v1037_v9 = vld [vmem:[%s1898_s3] sm:$0x1] }
 0x19a   :  { %v1368_v48 = vpop.f32.mrb[63].mxu0 }
 0x19b   :  { %v1447_v49 = vpop.f32.mrb[62].mxu1  ;;  %v1649_v50 = vpack.c.bf16 %v1034_v12, %v1033_v46  ;;  %v1013_v51 = vadd.f32 %v1446_v52, %v868_v61  ;;  %v1369_v62 = vadd.f32 %v1368_v48, %v1367_v47 }
 0x19c   :  { %v1448_v54 = vpop.f32.mrb[63].mxu1 }
 0x19d   :  { %v1449_v55 = vadd.f32 %v1448_v54, %v1447_v49  ;;  %v873_v56 = vadd.f32 %v1369_v62, %v1852_v19  ;;  %1650 = vmatpush3.bf16.xpose.msra.mxu0 %v1649_v50  ;;  %v1035_v21 = vmax.f32 %v1013_v51, 0.0 }
 0x19e   :  { %1651 = vmatprep.subr.bf16.mxu0 %v1742_v0 }
 0x19f   :  { %v1018_v7 = vadd.f32 %v1449_v55, %v873_v56 }
 0x1a1   :  { %v1036_v57 = vmax.f32 %v1018_v7, 0.0 }
 0x1a3   :  { %v1652_v58 = vpack.c.bf16 %v1036_v57, %v1035_v21 }
 0x1a5   :  { %1653 = vmatpush3.bf16.xpose.msra.mxu0 %v1652_v58 }
 0x1ac   :  { %1500 = vmatmul.mubr.f32.vlgmr.msra.gmra.mrb[64].mxu0 %v1037_v9 }
 0x27f   :  { %v1106_v60 = vpop.f32.mrb[64].mxu0 }
 0x280   :  { %v1107_v63 = vadd.f32 %v1106_v60, %v1039_v59  ;;  %v1501_v19 = vpop.f32.mrb[65].mxu0 }
 0x282   :  { %v1110_v0 = vmax.f32 %v1107_v63, 0.0 }
 0x284   :  { %v1111_v1 = vmin.f32 %v1110_v0, 6.0 }
 0x286   :  { %1112 = vst [vmem:[#allocation8] sm:$0x1] %v1111_v1 }
 0x287   :  { %1719 = shalt.err (!%p1716_p6)
}
 0x288   :  { %s1720_s4 = scalar_lea.hbm %s1900_s5, 16 }
 0x289   :  { %p1721_p7 = scmp.ne.s32.totalorder %s1900_s5, %s1720_s4  ;;  %p1724_p8 = scmp.lt.u32.totalorder %s1720_s4, %s1900_s5 }
 0x28b   :  { %p1726_p9 = pnand %p1724_p8, %p1721_p7 }
 0x28d   :  { %1729 = shalt.err (!%p1726_p9)
}
 0x28e   :  { %1122 = dma.vmem_to_hbm [thread:$0]  %s1120_s25, 16, %s1900_s5, [#allocation5]  }
 0x28f   :  { %1734 = dma.done.wait [#allocation5], 16  }
 0x290   :  { %1735 = vsyncadd [#allocation5], 4294967280 }
 0x291   :  { %1126 = vsyncpa [#allocation4], 1 }
 0x292   :  { %1127 = vsyncpa [#allocation7], 1 }
 0x293   :  { %1128 = vsyncpa [#allocation5], 1 }

</bundles_post_ra>
